<compile_context>
chip_gen: v5e
topology: v5e:2x2
jax: 0.10.0
libtpu: 0.0.40
codegen_flags: <defaults>
</compile_context>

<pallas_src>
import functools

import jax
import jax.numpy as jnp
from jax.experimental import pallas as pl
from jax.experimental.pallas import tpu as pltpu


HID = 64           # hidden width of the PyTorch module (nn.Linear(dim_in, 64))
HID_PAD = 128      # hidden width zero-padded to one full 128-lane vreg
TIGHT_LANES = 128  # packed single-vreg output width (used when 3*dim_out <= 128)


# ---------------------------------------------------------------------------
# In-kernel standard-normal draw (torch.randn_like equivalent).
# ---------------------------------------------------------------------------
def _draw_normal(shape):
    """Standard-normal noise from the TPU hardware PRNG (call prng_seed first)."""
    if hasattr(pltpu, "stateful_normal"):
        return pltpu.stateful_normal(shape, jnp.float32)

    # Fallback: Box-Muller from raw PRNG bits (24-bit-mantissa uniforms).
    def _uniform():
        bits = pltpu.prng_random_bits(shape)
        bits = jax.lax.bitwise_and(bits, jnp.array(0x00FFFFFF, bits.dtype))
        return bits.astype(jnp.float32) * (1.0 / (1 << 24))      # [0, 1)

    u1 = 1.0 - _uniform()                                        # (0, 1]
    u2 = _uniform()
    r = jnp.sqrt(-2.0 * jnp.log(u1))
    return r * jnp.cos((2.0 * jnp.pi) * u2)


# ---------------------------------------------------------------------------
# Kernel body (shared by the in-kernel-RNG and host-eps variants).
# ---------------------------------------------------------------------------
def _encoder_body(x, y, eps, w1x, w1y, b1, w2, b2, w3, b3, out_ref, *,
                  dim_out, tight):
    f32, bf16 = jnp.float32, jnp.bfloat16
    # fc1: concat(x, y) @ W1 folded into two lane-aligned dots (no HBM concat).
    h1 = (jnp.dot(x, w1x, preferred_element_type=f32)
          + jnp.dot(y, w1y, preferred_element_type=f32) + b1)
    h1 = jnp.maximum(h1, 0.0)                                    # f32 epilogue
    # fc2
    h2 = jnp.maximum(
        jnp.dot(h1.astype(bf16), w2, preferred_element_type=f32) + b2, 0.0)
    # fc3: ONE fused dot for both heads (N = 2*128 fills the v6e/v7x MXU).
    ml = jnp.dot(h2.astype(bf16), w3, preferred_element_type=f32) + b3

    d = dim_out
    if tight:
        # Weight packing (see prepare_kernel_params):
        #   ml[:, 0:128]   = [ mu | logvar | mu     | 0 ]
        #   ml[:, 128:256] = [ 0  | 0      | logvar | 0 ]
        # so eps*exp(0.5*blockB) + blockA equals `sample` exactly at lanes
        # [2d:3d) — no lane shuffles, all slices/stores 128-aligned.
        blk_a = ml[:, :TIGHT_LANES]
        blk_b = ml[:, TIGHT_LANES:]
        samp = eps * jnp.exp(0.5 * blk_b) + blk_a
        lane = jax.lax.broadcasted_iota(jnp.int32, blk_a.shape, 1)
        packed = jnp.where(lane < 2 * d, blk_a,
                           jnp.where(lane < 3 * d, samp, 0.0))
        out_ref[...] = packed.astype(out_ref.dtype)              # (tb, 128) bf16
    else:
        out_pad = ml.shape[-1] // 2
        mu = ml[:, :out_pad]
        lv = ml[:, out_pad:]
        samp = eps * jnp.exp(0.5 * lv) + mu
        lane = jax.lax.broadcasted_iota(jnp.int32, samp.shape, 1)
        samp = jnp.where(lane < d, samp, 0.0)                    # zero the pad
        out_ref[:, : 2 * out_pad] = ml.astype(out_ref.dtype)     # [mu_pad|lv_pad]
        out_ref[:, 2 * out_pad:] = samp.astype(out_ref.dtype)    # [sample_pad]


def _rng_kernel(seed_ref, x_ref, y_ref, w1x_ref, w1y_ref, b1_ref, w2_ref,
                b2_ref, w3_ref, b3_ref, out_ref, *, dim_out, tight, eps_lanes):
    # Per-grid-step seed: fresh, independent noise for every batch tile.
    pltpu.prng_seed(seed_ref[0] + pl.program_id(0))
    eps = _draw_normal((out_ref.shape[0], eps_lanes))
    _encoder_body(x_ref[...], y_ref[...], eps, w1x_ref[...], w1y_ref[...],
                  b1_ref[...], w2_ref[...], b2_ref[...], w3_ref[...],
                  b3_ref[...], out_ref, dim_out=dim_out, tight=tight)


def _eps_kernel(seed_ref, x_ref, y_ref, eps_ref, w1x_ref, w1y_ref, b1_ref,
                w2_ref, b2_ref, w3_ref, b3_ref, out_ref, *, dim_out, tight,
                eps_lanes):
    del seed_ref, eps_lanes      # noise arrives from HBM in this fallback variant
    _encoder_body(x_ref[...], y_ref[...], eps_ref[...], w1x_ref[...],
                  w1y_ref[...], b1_ref[...], w2_ref[...], b2_ref[...],
                  w3_ref[...], b3_ref[...], out_ref,
                  dim_out=dim_out, tight=tight)


# ---------------------------------------------------------------------------
# Parameters.
# ---------------------------------------------------------------------------
def init_params(key, dim_in, dim_out):
    """Logical f32 parameters, stored (in, out) — mirrors the nn.Linear shapes."""
    ks = jax.random.split(key, 6)
    w1 = jax.random.normal(ks[0], (dim_in, HID), jnp.float32) * 0.1
    b1 = jax.random.normal(ks[1], (HID,), jnp.float32) * 0.1
    w2 = jax.random.normal(ks[2], (HID, HID), jnp.float32) * 0.1
    b2 = jax.random.normal(ks[3], (HID,), jnp.float32) * 0.1
    w3 = jax.random.normal(ks[4], (HID, 2 * dim_out), jnp.float32) * 0.1
    b3 = jax.random.normal(ks[5], (2 * dim_out,), jnp.float32) * 0.1
    return (w1, b1, w2, b2, w3, b3)


def _pad2d(a, rows, cols):
    return jnp.pad(a, ((0, rows - a.shape[0]), (0, cols - a.shape[1])))


def prepare_kernel_params(params, dx, dim_out):
    """Pad / pack / bf16-cast the logical params into the kernel layout.

    Call ONCE and reuse across encoder_w calls — the weights then stay
    VMEM-resident inside the kernel and are never re-padded per call."""
    w1, b1, w2, b2, w3, b3 = params
    dim_in = w1.shape[0]
    dy = dim_in - dx
    bf16, f32 = jnp.bfloat16, jnp.float32
    d = dim_out

    w1x = _pad2d(w1[:dx], dx, HID_PAD).astype(bf16)
    w1y = _pad2d(w1[dx:], dy, HID_PAD).astype(bf16)
    b1p = _pad2d(b1.reshape(1, -1), 1, HID_PAD).astype(f32)
    w2p = _pad2d(w2, HID_PAD, HID_PAD).astype(bf16)
    b2p = _pad2d(b2.reshape(1, -1), 1, HID_PAD).astype(f32)

    wmu, wlv = w3[:, :d], w3[:, d:]
    bmu, blv = b3[:d], b3[d:]
    tight = 3 * d <= TIGHT_LANES
    if tight:
        # Packed head weight (rows, 256): block A = [Wmu|Wlv|Wmu|0],
        # block B = [0|0|Wlv|0]; ONE dot then yields mu/logvar/sample-aligned
        # operands with no in-kernel lane shuffles.
        head = 2 * TIGHT_LANES
        w3p = jnp.zeros((w3.shape[0], head), f32)
        w3p = w3p.at[:, 0:d].set(wmu).at[:, d:2 * d].set(wlv)
        w3p = w3p.at[:, 2 * d:3 * d].set(wmu)
        w3p = w3p.at[:, TIGHT_LANES + 2 * d:TIGHT_LANES + 3 * d].set(wlv)
        b3p = jnp.zeros((head,), f32)
        b3p = b3p.at[0:d].set(bmu).at[d:2 * d].set(blv).at[2 * d:3 * d].set(bmu)
        b3p = b3p.at[TIGHT_LANES + 2 * d:TIGHT_LANES + 3 * d].set(blv)
        out_pad = None
        eps_lanes = TIGHT_LANES
        out_lanes = TIGHT_LANES
    else:
        out_pad = ((d + 127) // 128) * 128
        head = 2 * out_pad
        w3p = jnp.zeros((w3.shape[0], head), f32)
        w3p = w3p.at[:, 0:d].set(wmu).at[:, out_pad:out_pad + d].set(wlv)
        b3p = jnp.zeros((head,), f32)
        b3p = b3p.at[0:d].set(bmu).at[out_pad:out_pad + d].set(blv)
        eps_lanes = out_pad
        out_lanes = 3 * out_pad
    w3p = _pad2d(w3p, HID_PAD, head).astype(bf16)
    b3p = b3p.reshape(1, head).astype(f32)

    return dict(dx=dx, dy=dy, dim_out=d, tight=tight, out_pad=out_pad,
                eps_lanes=eps_lanes, out_lanes=out_lanes, head_lanes=head,
                w1x=w1x, w1y=w1y, b1=b1p, w2=w2p, b2=b2p, w3=w3p, b3=b3p)


# ---------------------------------------------------------------------------
# pallas_call construction (cached per static config).
# ---------------------------------------------------------------------------
_CALL_CACHE = {}


def _get_call(batch, tb, dx, dy, dim_out, tight, eps_lanes, out_lanes,
              head_lanes, use_rng):
    key = (batch, tb, dx, dy, dim_out, tight, eps_lanes, out_lanes,
           head_lanes, use_rng)
    call = _CALL_CACHE.get(key)
    if call is not None:
        return call

    def bmap(i, seed_ref):       # batch-tiled streams
        return (i, 0)

    def cmap(i, seed_ref):       # constant index -> weights stay VMEM-resident
        return (0, 0)

    in_specs = [pl.BlockSpec((tb, dx), bmap),
                pl.BlockSpec((tb, dy), bmap)]
    if not use_rng:
        in_specs.append(pl.BlockSpec((tb, eps_lanes), bmap))   # host eps (fallback)
    in_specs += [
        pl.BlockSpec((dx, HID_PAD), cmap),          # w1x
        pl.BlockSpec((dy, HID_PAD), cmap),          # w1y
        pl.BlockSpec((1, HID_PAD), cmap),           # b1
        pl.BlockSpec((HID_PAD, HID_PAD), cmap),     # w2
        pl.BlockSpec((1, HID_PAD), cmap),           # b2
        pl.BlockSpec((HID_PAD, head_lanes), cmap),  # w3 (fused / packed heads)
        pl.BlockSpec((1, head_lanes), cmap),        # b3
    ]

    kern = _rng_kernel if use_rng else _eps_kernel
    kern = functools.partial(kern, dim_out=dim_out, tight=tight,
                             eps_lanes=eps_lanes)

    call = pl.pallas_call(
        kern,
        grid_spec=pltpu.PrefetchScalarGridSpec(
            num_scalar_prefetch=1,                  # int32 seed lands in SMEM
            grid=(batch // tb,),
            in_specs=in_specs,
            out_specs=pl.BlockSpec((tb, out_lanes), bmap),
        ),
        out_shape=jax.ShapeDtypeStruct((batch, out_lanes), jnp.bfloat16),
        compiler_params=pltpu.CompilerParams(
            # Batch tiles are independent. On v7x, if profiling shows a single
            # TensorCore engaged, switch to pltpu.CORE_PARALLEL (needs >= 2,
            # ideally an even number of, batch tiles).
            dimension_semantics=("parallel",),
            vmem_limit_bytes=32 * 1024 * 1024,      # explicit; footprint is tiny
        ),
    )
    _CALL_CACHE[key] = call
    return call


def _pick_tb(batch, cap):
    """Largest 16-aligned divisor of `batch` that is <= cap (or the full batch)."""
    if batch <= cap:
        return batch
    t = (min(cap, batch) // 16) * 16
    while t >= 16:
        if batch % t == 0:
            return t
        t -= 16
    # No 16-aligned divisor <= cap: process the (ragged) batch as one tile.
    return batch


# ---------------------------------------------------------------------------
# Public wrappers.
# ---------------------------------------------------------------------------
_USE_IN_KERNEL_RNG = None    # None = not probed yet; then True / False


def encoder_w_packed(x, y, kparams, seed, *, block_batch=4096):
    """Fused EncoderW forward; returns the packed bf16 output slab.

    `seed` must be a fresh int per call (torch.randn_like = fresh noise each
    call). Per-row double-buffered VMEM is ~0.7 KiB, so block_batch=4096 fits
    comfortably inside v7x's 64 MiB VMEM (and trivially on v5e/v6e)."""
    global _USE_IN_KERNEL_RNG
    batch, dx = x.shape
    dy = y.shape[1]
    assert dx == kparams["dx"] and dy == kparams["dy"]
    tb = _pick_tb(batch, block_batch)

    xb = x.astype(jnp.bfloat16)            # halve activation DMA bytes
    yb = y.astype(jnp.bfloat16)
    seed_arr = jnp.array([seed], dtype=jnp.int32)
    weights = (kparams["w1x"], kparams["w1y"], kparams["b1"], kparams["w2"],
               kparams["b2"], kparams["w3"], kparams["b3"])

    def run(use_rng):
        call = _get_call(batch, tb, dx, dy, kparams["dim_out"],
                         kparams["tight"], kparams["eps_lanes"],
                         kparams["out_lanes"], kparams["head_lanes"], use_rng)
        if use_rng:
            return call(seed_arr, xb, yb, *weights)
        # Host-eps fallback (only if the in-kernel PRNG path fails to lower).
        eps = jax.random.normal(jax.random.PRNGKey(seed),
                                (batch, kparams["eps_lanes"]), jnp.float32)
        return call(seed_arr, xb, yb, eps, *weights)

    if _USE_IN_KERNEL_RNG is None:
        try:
            out = run(True)
            jax.block_until_ready(out)
            _USE_IN_KERNEL_RNG = True
            return out
        except Exception:
            _USE_IN_KERNEL_RNG = False
    return run(_USE_IN_KERNEL_RNG)


def encoder_w(x, y, kparams, seed, *, block_batch=4096):
    """Module-contract wrapper: (mu, logvar, sample), each (B, dim_out) bf16.

    NOTE: downstream code should prefer consuming encoder_w_packed's slab
    directly — the thin slices below are an avoidable second pass over the
    output if they get materialized."""
    out = encoder_w_packed(x, y, kparams, seed, block_batch=block_batch)
    d = kparams["dim_out"]
    if kparams["tight"]:
        return out[:, :d], out[:, d:2 * d], out[:, 2 * d:3 * d]
    op = kparams["out_pad"]
    return out[:, :d], out[:, op:op + d], out[:, 2 * op:2 * op + d]


# ---------------------------------------------------------------------------
# Demo / self-check.
# ---------------------------------------------------------------------------
if __name__ == "__main__":
    batch, dx, dy, dim_out = 64, 16, 16, 32
    dim_in = dx + dy

    root = jax.random.PRNGKey(0)
    kx, ky, kp = jax.random.split(root, 3)
    x = jax.random.normal(kx, (batch, dx), jnp.float32)
    y = jax.random.normal(ky, (batch, dy), jnp.float32)
    params = init_params(kp, dim_in, dim_out)

    # Pad / pack / cast the weights ONCE; reuse across calls.
    kparams = prepare_kernel_params(params, dx, dim_out)

    # Small block_batch here only to exercise a multi-step grid (resident
    # weights + per-step PRNG seeding); the production default is 4096.
    mu, logvar, sample = encoder_w(x, y, kparams, seed=1234, block_batch=32)
    jax.block_until_ready((mu, logvar, sample))

    # Pure-JAX reference with matching numerics (bf16 operands, f32 accumulate).
    w1, b1, w2, b2, w3, b3 = params
    bf16, f32 = jnp.bfloat16, jnp.float32

    def mm(a, b):
        return jnp.dot(a.astype(bf16), b.astype(bf16),
                       preferred_element_type=f32)

    h1 = jnp.maximum(mm(x, w1[:dx]) + mm(y, w1[dx:]) + b1, 0.0)
    h2 = jnp.maximum(mm(h1, w2) + b2, 0.0)
    mu_r = mm(h2, w3[:, :dim_out]) + b3[:dim_out]
    lv_r = mm(h2, w3[:, dim_out:]) + b3[dim_out:]

    assert bool(jnp.allclose(mu.astype(f32), mu_r, atol=2e-2, rtol=2e-2))
    assert bool(jnp.allclose(logvar.astype(f32), lv_r, atol=2e-2, rtol=2e-2))

    # sample = eps * exp(0.5*logvar) + mu with eps ~ N(0, 1) drawn in-kernel:
    # verify the implied eps is finite, ~zero-mean and ~unit-std (loose bounds).
    eps_impl = (sample.astype(f32) - mu_r) / jnp.exp(0.5 * lv_r)
    assert bool(jnp.all(jnp.isfinite(eps_impl)))
    m = float(jnp.mean(eps_impl))
    s = float(jnp.std(eps_impl))
    assert abs(m) < 0.3, m
    assert 0.5 < s < 1.5, s

    print("KERNEL_OK")
</pallas_src>

<mosaic_0001>
module attributes {stable_mosaic.version = 11 : i64} {
  func.func @_rng_kernel(%arg0: i32, %arg1: memref<1xi32, #tpu.memory_space<smem>>, %arg2: memref<32x16xbf16, #tpu.memory_space<vmem>>, %arg3: memref<32x16xbf16, #tpu.memory_space<vmem>>, %arg4: memref<16x128xbf16, #tpu.memory_space<vmem>>, %arg5: memref<16x128xbf16, #tpu.memory_space<vmem>>, %arg6: memref<1x128xf32, #tpu.memory_space<vmem>>, %arg7: memref<128x128xbf16, #tpu.memory_space<vmem>>, %arg8: memref<1x128xf32, #tpu.memory_space<vmem>>, %arg9: memref<128x256xbf16, #tpu.memory_space<vmem>>, %arg10: memref<1x256xf32, #tpu.memory_space<vmem>>, %arg11: memref<32x128xbf16, #tpu.memory_space<vmem>>) attributes {dimension_semantics = [#tpu.dimension_semantics<parallel>], iteration_bounds = array<i64: 2>, scalar_prefetch = 1 : i64, scratch_operands = 0 : i64, tpu.core_type = #tpu.core_type<tc>, window_params = [{transform_indices = @transform_0, window_bounds = array<i64: 32, 16>}, {transform_indices = @transform_1, window_bounds = array<i64: 32, 16>}, {pipeline_mode = #tpu.pipeline_mode<synchronous>, transform_indices = @transform_2, window_bounds = array<i64: 16, 128>}, {pipeline_mode = #tpu.pipeline_mode<synchronous>, transform_indices = @transform_3, window_bounds = array<i64: 16, 128>}, {pipeline_mode = #tpu.pipeline_mode<synchronous>, transform_indices = @transform_4, window_bounds = array<i64: 1, 128>}, {pipeline_mode = #tpu.pipeline_mode<synchronous>, transform_indices = @transform_5, window_bounds = array<i64: 128, 128>}, {pipeline_mode = #tpu.pipeline_mode<synchronous>, transform_indices = @transform_6, window_bounds = array<i64: 1, 128>}, {pipeline_mode = #tpu.pipeline_mode<synchronous>, transform_indices = @transform_7, window_bounds = array<i64: 128, 256>}, {pipeline_mode = #tpu.pipeline_mode<synchronous>, transform_indices = @transform_8, window_bounds = array<i64: 1, 256>}, {transform_indices = @transform_9, window_bounds = array<i64: 32, 128>}]} {
    %c0 = arith.constant 0 : index
    %0 = memref.load %arg1[%c0] : memref<1xi32, #tpu.memory_space<smem>>
    %1 = arith.addi %0, %arg0 : i32
    "tpu.prng_set_seed_32"(%1) : (i32) -> ()
    %c0_i32 = arith.constant 0 : i32
    %c0_i32_0 = arith.constant 0 : i32
    %cst = arith.constant -0.99999994 : f32
    %cst_1 = arith.constant 1.000000e+00 : f32
    %2 = vector.broadcast %cst : f32 to vector<1x1xf32>
    %3 = vector.broadcast %cst_1 : f32 to vector<1x1xf32>
    %4 = "tpu.prng_random_bits"() : () -> vector<32x128xi32>
    %c9_i32 = arith.constant 9 : i32
    %5 = vector.broadcast %c9_i32 : i32 to vector<32x128xi32>
    %6 = arith.shrui %4, %5 : vector<32x128xi32>
    %c1065353216_i32 = arith.constant 1065353216 : i32
    %7 = vector.broadcast %c1065353216_i32 : i32 to vector<32x128xi32>
    %8 = arith.ori %6, %7 : vector<32x128xi32>
    %9 = tpu.bitcast %8 : vector<32x128xi32> -> vector<32x128xf32>
    %cst_2 = arith.constant 1.000000e+00 : f32
    %10 = vector.broadcast %cst_2 : f32 to vector<32x128xf32>
    %11 = arith.subf %9, %10 : vector<32x128xf32>
    %12 = arith.subf %3, %2 : vector<1x1xf32>
    %13 = vector.broadcast %12 : vector<1x1xf32> to vector<32x128xf32>
    %14 = arith.mulf %11, %13 : vector<32x128xf32>
    %15 = vector.broadcast %2 : vector<1x1xf32> to vector<32x128xf32>
    %16 = arith.addf %14, %15 : vector<32x128xf32>
    %17 = vector.broadcast %2 : vector<1x1xf32> to vector<32x128xf32>
    %18 = arith.maximumf %17, %16 : vector<32x128xf32>
    %cst_3 = arith.constant 0.000000e+00 : f32
    %19 = vector.broadcast %cst_3 : f32 to vector<32x128xf32>
    %20 = arith.subf %19, %18 : vector<32x128xf32>
    %21 = arith.mulf %18, %20 : vector<32x128xf32>
    %22 = math.log1p %21 : vector<32x128xf32>
    %cst_4 = arith.constant 0.000000e+00 : f32
    %23 = vector.broadcast %cst_4 : f32 to vector<32x128xf32>
    %24 = arith.subf %23, %22 : vector<32x128xf32>
    %cst_5 = arith.constant 5.000000e+00 : f32
    %25 = vector.broadcast %cst_5 : f32 to vector<32x128xf32>
    %26 = arith.cmpf olt, %24, %25 : vector<32x128xf32>
    %cst_6 = arith.constant 2.500000e+00 : f32
    %27 = vector.broadcast %cst_6 : f32 to vector<32x128xf32>
    %28 = arith.subf %24, %27 : vector<32x128xf32>
    %29 = math.sqrt %24 : vector<32x128xf32>
    %cst_7 = arith.constant 3.000000e+00 : f32
    %30 = vector.broadcast %cst_7 : f32 to vector<32x128xf32>
    %31 = arith.subf %29, %30 : vector<32x128xf32>
    %32 = arith.select %26, %28, %31 : vector<32x128xi1>, vector<32x128xf32>
    %cst_8 = arith.constant 2.81022636E-8 : f32
    %cst_9 = arith.constant -2.00214257E-4 : f32
    %33 = vector.broadcast %cst_8 : f32 to vector<32x128xf32>
    %34 = vector.broadcast %cst_9 : f32 to vector<32x128xf32>
    %35 = arith.select %26, %33, %34 : vector<32x128xi1>, vector<32x128xf32>
    %cst_10 = arith.constant 3.43273939E-7 : f32
    %cst_11 = arith.constant 1.00950558E-4 : f32
    %36 = vector.broadcast %cst_10 : f32 to vector<32x128xf32>
    %37 = vector.broadcast %cst_11 : f32 to vector<32x128xf32>
    %38 = arith.select %26, %36, %37 : vector<32x128xi1>, vector<32x128xf32>
    %39 = arith.mulf %35, %32 : vector<32x128xf32>
    %40 = arith.addf %38, %39 : vector<32x128xf32>
    %cst_12 = arith.constant -3.5233877E-6 : f32
    %cst_13 = arith.constant 0.00134934322 : f32
    %41 = vector.broadcast %cst_12 : f32 to vector<32x128xf32>
    %42 = vector.broadcast %cst_13 : f32 to vector<32x128xf32>
    %43 = arith.select %26, %41, %42 : vector<32x128xi1>, vector<32x128xf32>
    %44 = arith.mulf %40, %32 : vector<32x128xf32>
    %45 = arith.addf %43, %44 : vector<32x128xf32>
    %cst_14 = arith.constant -4.39150654E-6 : f32
    %cst_15 = arith.constant -0.00367342844 : f32
    %46 = vector.broadcast %cst_14 : f32 to vector<32x128xf32>
    %47 = vector.broadcast %cst_15 : f32 to vector<32x128xf32>
    %48 = arith.select %26, %46, %47 : vector<32x128xi1>, vector<32x128xf32>
    %49 = arith.mulf %45, %32 : vector<32x128xf32>
    %50 = arith.addf %48, %49 : vector<32x128xf32>
    %cst_16 = arith.constant 2.1858087E-4 : f32
    %cst_17 = arith.constant 0.00573950773 : f32
    %51 = vector.broadcast %cst_16 : f32 to vector<32x128xf32>
    %52 = vector.broadcast %cst_17 : f32 to vector<32x128xf32>
    %53 = arith.select %26, %51, %52 : vector<32x128xi1>, vector<32x128xf32>
    %54 = arith.mulf %50, %32 : vector<32x128xf32>
    %55 = arith.addf %53, %54 : vector<32x128xf32>
    %cst_18 = arith.constant -0.00125372503 : f32
    %cst_19 = arith.constant -0.0076224613 : f32
    %56 = vector.broadcast %cst_18 : f32 to vector<32x128xf32>
    %57 = vector.broadcast %cst_19 : f32 to vector<32x128xf32>
    %58 = arith.select %26, %56, %57 : vector<32x128xi1>, vector<32x128xf32>
    %59 = arith.mulf %55, %32 : vector<32x128xf32>
    %60 = arith.addf %58, %59 : vector<32x128xf32>
    %cst_20 = arith.constant -0.00417768164 : f32
    %cst_21 = arith.constant 0.00943887047 : f32
    %61 = vector.broadcast %cst_20 : f32 to vector<32x128xf32>
    %62 = vector.broadcast %cst_21 : f32 to vector<32x128xf32>
    %63 = arith.select %26, %61, %62 : vector<32x128xi1>, vector<32x128xf32>
    %64 = arith.mulf %60, %32 : vector<32x128xf32>
    %65 = arith.addf %63, %64 : vector<32x128xf32>
    %cst_22 = arith.constant 0.246640727 : f32
    %cst_23 = arith.constant 1.00167406 : f32
    %66 = vector.broadcast %cst_22 : f32 to vector<32x128xf32>
    %67 = vector.broadcast %cst_23 : f32 to vector<32x128xf32>
    %68 = arith.select %26, %66, %67 : vector<32x128xi1>, vector<32x128xf32>
    %69 = arith.mulf %65, %32 : vector<32x128xf32>
    %70 = arith.addf %68, %69 : vector<32x128xf32>
    %cst_24 = arith.constant 1.50140941 : f32
    %cst_25 = arith.constant 2.83297682 : f32
    %71 = vector.broadcast %cst_24 : f32 to vector<32x128xf32>
    %72 = vector.broadcast %cst_25 : f32 to vector<32x128xf32>
    %73 = arith.select %26, %71, %72 : vector<32x128xi1>, vector<32x128xf32>
    %74 = arith.mulf %70, %32 : vector<32x128xf32>
    %75 = arith.addf %73, %74 : vector<32x128xf32>
    %76 = math.absf %18 : vector<32x128xf32>
    %cst_26 = arith.constant 1.000000e+00 : f32
    %77 = vector.broadcast %cst_26 : f32 to vector<32x128xf32>
    %78 = arith.cmpf oeq, %76, %77 : vector<32x128xf32>
    %cst_27 = arith.constant 0x7F800000 : f32
    %79 = vector.broadcast %cst_27 : f32 to vector<32x128xf32>
    %80 = arith.mulf %79, %18 : vector<32x128xf32>
    %81 = arith.mulf %75, %18 : vector<32x128xf32>
    %82 = arith.select %78, %80, %81 : vector<32x128xi1>, vector<32x128xf32>
    %cst_28 = arith.constant 1.41421354 : f32
    %83 = vector.broadcast %cst_28 : f32 to vector<32x128xf32>
    %84 = arith.mulf %83, %82 : vector<32x128xf32>
    %c0_29 = arith.constant 0 : index
    %c0_30 = arith.constant 0 : index
    %85 = vector.load %arg2[%c0_29, %c0_30] : memref<32x16xbf16, #tpu.memory_space<vmem>>, vector<32x16xbf16>
    %c0_31 = arith.constant 0 : index
    %c0_32 = arith.constant 0 : index
    %86 = vector.load %arg3[%c0_31, %c0_32] : memref<32x16xbf16, #tpu.memory_space<vmem>>, vector<32x16xbf16>
    %c0_33 = arith.constant 0 : index
    %c0_34 = arith.constant 0 : index
    %87 = vector.load %arg4[%c0_33, %c0_34] : memref<16x128xbf16, #tpu.memory_space<vmem>>, vector<16x128xbf16>
    %c0_35 = arith.constant 0 : index
    %c0_36 = arith.constant 0 : index
    %88 = vector.load %arg5[%c0_35, %c0_36] : memref<16x128xbf16, #tpu.memory_space<vmem>>, vector<16x128xbf16>
    %c0_37 = arith.constant 0 : index
    %c0_38 = arith.constant 0 : index
    %89 = vector.load %arg6[%c0_37, %c0_38] : memref<1x128xf32, #tpu.memory_space<vmem>>, vector<1x128xf32>
    %c0_39 = arith.constant 0 : index
    %c0_40 = arith.constant 0 : index
    %90 = vector.load %arg7[%c0_39, %c0_40] : memref<128x128xbf16, #tpu.memory_space<vmem>>, vector<128x128xbf16>
    %c0_41 = arith.constant 0 : index
    %c0_42 = arith.constant 0 : index
    %91 = vector.load %arg8[%c0_41, %c0_42] : memref<1x128xf32, #tpu.memory_space<vmem>>, vector<1x128xf32>
    %c0_43 = arith.constant 0 : index
    %c0_44 = arith.constant 0 : index
    %92 = vector.load %arg9[%c0_43, %c0_44] : memref<128x256xbf16, #tpu.memory_space<vmem>>, vector<128x256xbf16>
    %c0_45 = arith.constant 0 : index
    %c0_46 = arith.constant 0 : index
    %93 = vector.load %arg10[%c0_45, %c0_46] : memref<1x256xf32, #tpu.memory_space<vmem>>, vector<1x256xf32>
    %cst_47 = arith.constant dense<0.000000e+00> : vector<32x128xf32>
    %94 = tpu.matmul %85, %87, %cst_47 {dimension_numbers = #tpu.dot_dimension_numbers<[1], [0], [0], [1], [0, 0, 1, 1], [], []>} : vector<32x16xbf16>, vector<16x128xbf16>, vector<32x128xf32> -> vector<32x128xf32>
    %cst_48 = arith.constant dense<0.000000e+00> : vector<32x128xf32>
    %95 = tpu.matmul %86, %88, %cst_48 {dimension_numbers = #tpu.dot_dimension_numbers<[1], [0], [0], [1], [0, 0, 1, 1], [], []>} : vector<32x16xbf16>, vector<16x128xbf16>, vector<32x128xf32> -> vector<32x128xf32>
    %96 = arith.addf %94, %95 : vector<32x128xf32>
    %97 = vector.broadcast %89 : vector<1x128xf32> to vector<32x128xf32>
    %98 = arith.addf %96, %97 : vector<32x128xf32>
    %cst_49 = arith.constant 0.000000e+00 : f32
    %99 = vector.broadcast %cst_49 : f32 to vector<32x128xf32>
    %100 = arith.maximumf %98, %99 : vector<32x128xf32>
    %101 = arith.truncf %100 : vector<32x128xf32> to vector<32x128xbf16>
    %cst_50 = arith.constant dense<0.000000e+00> : vector<32x128xf32>
    %102 = tpu.matmul %101, %90, %cst_50 {dimension_numbers = #tpu.dot_dimension_numbers<[1], [0], [0], [1], [0, 0, 1, 1], [], []>} : vector<32x128xbf16>, vector<128x128xbf16>, vector<32x128xf32> -> vector<32x128xf32>
    %103 = vector.broadcast %91 : vector<1x128xf32> to vector<32x128xf32>
    %104 = arith.addf %102, %103 : vector<32x128xf32>
    %cst_51 = arith.constant 0.000000e+00 : f32
    %105 = vector.broadcast %cst_51 : f32 to vector<32x128xf32>
    %106 = arith.maximumf %104, %105 : vector<32x128xf32>
    %107 = arith.truncf %106 : vector<32x128xf32> to vector<32x128xbf16>
    %cst_52 = arith.constant dense<0.000000e+00> : vector<32x256xf32>
    %108 = tpu.matmul %107, %92, %cst_52 {dimension_numbers = #tpu.dot_dimension_numbers<[1], [0], [0], [1], [0, 0, 1, 1], [], []>} : vector<32x128xbf16>, vector<128x256xbf16>, vector<32x256xf32> -> vector<32x256xf32>
    %109 = vector.broadcast %93 : vector<1x256xf32> to vector<32x256xf32>
    %110 = arith.addf %108, %109 : vector<32x256xf32>
    %111 = vector.extract_strided_slice %110 {offsets = [0, 0], sizes = [32, 128], strides = [1, 1]} : vector<32x256xf32> to vector<32x128xf32>
    %112 = vector.extract_strided_slice %110 {offsets = [0, 128], sizes = [32, 128], strides = [1, 1]} : vector<32x256xf32> to vector<32x128xf32>
    %cst_53 = arith.constant 5.000000e-01 : f32
    %113 = vector.broadcast %cst_53 : f32 to vector<32x128xf32>
    %114 = arith.mulf %113, %112 : vector<32x128xf32>
    %115 = math.exp %114 : vector<32x128xf32>
    %116 = arith.mulf %84, %115 : vector<32x128xf32>
    %117 = arith.addf %116, %111 : vector<32x128xf32>
    %118 = tpu.iota {dimensions = array<i32: 1>} : vector<32x128xi32>
    %c64_i32 = arith.constant 64 : i32
    %119 = vector.broadcast %c64_i32 : i32 to vector<32x128xi32>
    %120 = arith.cmpi slt, %118, %119 : vector<32x128xi32>
    %c96_i32 = arith.constant 96 : i32
    %121 = vector.broadcast %c96_i32 : i32 to vector<32x128xi32>
    %122 = arith.cmpi slt, %118, %121 : vector<32x128xi32>
    %cst_54 = arith.constant 0.000000e+00 : f32
    %123 = vector.broadcast %cst_54 : f32 to vector<32x128xf32>
    %124 = arith.select %122, %117, %123 : vector<32x128xi1>, vector<32x128xf32>
    %125 = arith.select %120, %111, %124 : vector<32x128xi1>, vector<32x128xf32>
    %126 = arith.truncf %125 : vector<32x128xf32> to vector<32x128xbf16>
    %c0_55 = arith.constant 0 : index
    %c0_56 = arith.constant 0 : index
    %127 = vector.load %arg11[%c0_55, %c0_56] : memref<32x128xbf16, #tpu.memory_space<vmem>>, vector<32x128xbf16>
    tpu.vector_store %arg11[%c0_55, %c0_56], %126 {strides = array<i32>} : memref<32x128xbf16, #tpu.memory_space<vmem>>, vector<32x128xbf16>,
    return
  }
  func.func @transform_0(%arg0: i32, %arg1: memref<1xi32, #tpu.memory_space<smem>>) -> (i32, i32) {
    %c0_i32 = arith.constant 0 : i32
    %c0_i32_0 = arith.constant 0 : i32
    return %arg0, %c0_i32 : i32, i32
  }
  func.func @transform_1(%arg0: i32, %arg1: memref<1xi32, #tpu.memory_space<smem>>) -> (i32, i32) {
    %c0_i32 = arith.constant 0 : i32
    %c0_i32_0 = arith.constant 0 : i32
    return %arg0, %c0_i32 : i32, i32
  }
  func.func @transform_2(%arg0: i32, %arg1: memref<1xi32, #tpu.memory_space<smem>>) -> (i32, i32) {
    %c0_i32 = arith.constant 0 : i32
    %c0_i32_0 = arith.constant 0 : i32
    %c0_i32_1 = arith.constant 0 : i32
    return %c0_i32, %c0_i32_0 : i32, i32
  }
  func.func @transform_3(%arg0: i32, %arg1: memref<1xi32, #tpu.memory_space<smem>>) -> (i32, i32) {
    %c0_i32 = arith.constant 0 : i32
    %c0_i32_0 = arith.constant 0 : i32
    %c0_i32_1 = arith.constant 0 : i32
    return %c0_i32, %c0_i32_0 : i32, i32
  }
  func.func @transform_4(%arg0: i32, %arg1: memref<1xi32, #tpu.memory_space<smem>>) -> (i32, i32) {
    %c0_i32 = arith.constant 0 : i32
    %c0_i32_0 = arith.constant 0 : i32
    %c0_i32_1 = arith.constant 0 : i32
    return %c0_i32, %c0_i32_0 : i32, i32
  }
  func.func @transform_5(%arg0: i32, %arg1: memref<1xi32, #tpu.memory_space<smem>>) -> (i32, i32) {
    %c0_i32 = arith.constant 0 : i32
    %c0_i32_0 = arith.constant 0 : i32
    %c0_i32_1 = arith.constant 0 : i32
    return %c0_i32, %c0_i32_0 : i32, i32
  }
  func.func @transform_6(%arg0: i32, %arg1: memref<1xi32, #tpu.memory_space<smem>>) -> (i32, i32) {
    %c0_i32 = arith.constant 0 : i32
    %c0_i32_0 = arith.constant 0 : i32
    %c0_i32_1 = arith.constant 0 : i32
    return %c0_i32, %c0_i32_0 : i32, i32
  }
  func.func @transform_7(%arg0: i32, %arg1: memref<1xi32, #tpu.memory_space<smem>>) -> (i32, i32) {
    %c0_i32 = arith.constant 0 : i32
    %c0_i32_0 = arith.constant 0 : i32
    %c0_i32_1 = arith.constant 0 : i32
    return %c0_i32, %c0_i32_0 : i32, i32
  }
  func.func @transform_8(%arg0: i32, %arg1: memref<1xi32, #tpu.memory_space<smem>>) -> (i32, i32) {
    %c0_i32 = arith.constant 0 : i32
    %c0_i32_0 = arith.constant 0 : i32
    %c0_i32_1 = arith.constant 0 : i32
    return %c0_i32, %c0_i32_0 : i32, i32
  }
  func.func @transform_9(%arg0: i32, %arg1: memref<1xi32, #tpu.memory_space<smem>>) -> (i32, i32) {
    %c0_i32 = arith.constant 0 : i32
    %c0_i32_0 = arith.constant 0 : i32
    return %arg0, %c0_i32 : i32, i32
  }
}

module attributes {stable_mosaic.version = 11 : i64} {
  func.func @_eps_kernel(%arg0: i32, %arg1: memref<1xi32, #tpu.memory_space<smem>>, %arg2: memref<32x16xbf16, #tpu.memory_space<vmem>>, %arg3: memref<32x16xbf16, #tpu.memory_space<vmem>>, %arg4: memref<32x128xf32, #tpu.memory_space<vmem>>, %arg5: memref<16x128xbf16, #tpu.memory_space<vmem>>, %arg6: memref<16x128xbf16, #tpu.memory_space<vmem>>, %arg7: memref<1x128xf32, #tpu.memory_space<vmem>>, %arg8: memref<128x128xbf16, #tpu.memory_space<vmem>>, %arg9: memref<1x128xf32, #tpu.memory_space<vmem>>, %arg10: memref<128x256xbf16, #tpu.memory_space<vmem>>, %arg11: memref<1x256xf32, #tpu.memory_space<vmem>>, %arg12: memref<32x128xbf16, #tpu.memory_space<vmem>>) attributes {dimension_semantics = [#tpu.dimension_semantics<parallel>], iteration_bounds = array<i64: 2>, scalar_prefetch = 1 : i64, scratch_operands = 0 : i64, tpu.core_type = #tpu.core_type<tc>, window_params = [{transform_indices = @transform_0, window_bounds = array<i64: 32, 16>}, {transform_indices = @transform_1, window_bounds = array<i64: 32, 16>}, {transform_indices = @transform_2, window_bounds = array<i64: 32, 128>}, {pipeline_mode = #tpu.pipeline_mode<synchronous>, transform_indices = @transform_3, window_bounds = array<i64: 16, 128>}, {pipeline_mode = #tpu.pipeline_mode<synchronous>, transform_indices = @transform_4, window_bounds = array<i64: 16, 128>}, {pipeline_mode = #tpu.pipeline_mode<synchronous>, transform_indices = @transform_5, window_bounds = array<i64: 1, 128>}, {pipeline_mode = #tpu.pipeline_mode<synchronous>, transform_indices = @transform_6, window_bounds = array<i64: 128, 128>}, {pipeline_mode = #tpu.pipeline_mode<synchronous>, transform_indices = @transform_7, window_bounds = array<i64: 1, 128>}, {pipeline_mode = #tpu.pipeline_mode<synchronous>, transform_indices = @transform_8, window_bounds = array<i64: 128, 256>}, {pipeline_mode = #tpu.pipeline_mode<synchronous>, transform_indices = @transform_9, window_bounds = array<i64: 1, 256>}, {transform_indices = @transform_10, window_bounds = array<i64: 32, 128>}]} {
    %c0 = arith.constant 0 : index
    %c0_0 = arith.constant 0 : index
    %0 = vector.load %arg2[%c0, %c0_0] : memref<32x16xbf16, #tpu.memory_space<vmem>>, vector<32x16xbf16>
    %c0_1 = arith.constant 0 : index
    %c0_2 = arith.constant 0 : index
    %1 = vector.load %arg3[%c0_1, %c0_2] : memref<32x16xbf16, #tpu.memory_space<vmem>>, vector<32x16xbf16>
    %c0_3 = arith.constant 0 : index
    %c0_4 = arith.constant 0 : index
    %2 = vector.load %arg4[%c0_3, %c0_4] : memref<32x128xf32, #tpu.memory_space<vmem>>, vector<32x128xf32>
    %c0_5 = arith.constant 0 : index
    %c0_6 = arith.constant 0 : index
    %3 = vector.load %arg5[%c0_5, %c0_6] : memref<16x128xbf16, #tpu.memory_space<vmem>>, vector<16x128xbf16>
    %c0_7 = arith.constant 0 : index
    %c0_8 = arith.constant 0 : index
    %4 = vector.load %arg6[%c0_7, %c0_8] : memref<16x128xbf16, #tpu.memory_space<vmem>>, vector<16x128xbf16>
    %c0_9 = arith.constant 0 : index
    %c0_10 = arith.constant 0 : index
    %5 = vector.load %arg7[%c0_9, %c0_10] : memref<1x128xf32, #tpu.memory_space<vmem>>, vector<1x128xf32>
    %c0_11 = arith.constant 0 : index
    %c0_12 = arith.constant 0 : index
    %6 = vector.load %arg8[%c0_11, %c0_12] : memref<128x128xbf16, #tpu.memory_space<vmem>>, vector<128x128xbf16>
    %c0_13 = arith.constant 0 : index
    %c0_14 = arith.constant 0 : index
    %7 = vector.load %arg9[%c0_13, %c0_14] : memref<1x128xf32, #tpu.memory_space<vmem>>, vector<1x128xf32>
    %c0_15 = arith.constant 0 : index
    %c0_16 = arith.constant 0 : index
    %8 = vector.load %arg10[%c0_15, %c0_16] : memref<128x256xbf16, #tpu.memory_space<vmem>>, vector<128x256xbf16>
    %c0_17 = arith.constant 0 : index
    %c0_18 = arith.constant 0 : index
    %9 = vector.load %arg11[%c0_17, %c0_18] : memref<1x256xf32, #tpu.memory_space<vmem>>, vector<1x256xf32>
    %cst = arith.constant dense<0.000000e+00> : vector<32x128xf32>
    %10 = tpu.matmul %0, %3, %cst {dimension_numbers = #tpu.dot_dimension_numbers<[1], [0], [0], [1], [0, 0, 1, 1], [], []>} : vector<32x16xbf16>, vector<16x128xbf16>, vector<32x128xf32> -> vector<32x128xf32>
    %cst_19 = arith.constant dense<0.000000e+00> : vector<32x128xf32>
    %11 = tpu.matmul %1, %4, %cst_19 {dimension_numbers = #tpu.dot_dimension_numbers<[1], [0], [0], [1], [0, 0, 1, 1], [], []>} : vector<32x16xbf16>, vector<16x128xbf16>, vector<32x128xf32> -> vector<32x128xf32>
    %12 = arith.addf %10, %11 : vector<32x128xf32>
    %13 = vector.broadcast %5 : vector<1x128xf32> to vector<32x128xf32>
    %14 = arith.addf %12, %13 : vector<32x128xf32>
    %cst_20 = arith.constant 0.000000e+00 : f32
    %15 = vector.broadcast %cst_20 : f32 to vector<32x128xf32>
    %16 = arith.maximumf %14, %15 : vector<32x128xf32>
    %17 = arith.truncf %16 : vector<32x128xf32> to vector<32x128xbf16>
    %cst_21 = arith.constant dense<0.000000e+00> : vector<32x128xf32>
    %18 = tpu.matmul %17, %6, %cst_21 {dimension_numbers = #tpu.dot_dimension_numbers<[1], [0], [0], [1], [0, 0, 1, 1], [], []>} : vector<32x128xbf16>, vector<128x128xbf16>, vector<32x128xf32> -> vector<32x128xf32>
    %19 = vector.broadcast %7 : vector<1x128xf32> to vector<32x128xf32>
    %20 = arith.addf %18, %19 : vector<32x128xf32>
    %cst_22 = arith.constant 0.000000e+00 : f32
    %21 = vector.broadcast %cst_22 : f32 to vector<32x128xf32>
    %22 = arith.maximumf %20, %21 : vector<32x128xf32>
    %23 = arith.truncf %22 : vector<32x128xf32> to vector<32x128xbf16>
    %cst_23 = arith.constant dense<0.000000e+00> : vector<32x256xf32>
    %24 = tpu.matmul %23, %8, %cst_23 {dimension_numbers = #tpu.dot_dimension_numbers<[1], [0], [0], [1], [0, 0, 1, 1], [], []>} : vector<32x128xbf16>, vector<128x256xbf16>, vector<32x256xf32> -> vector<32x256xf32>
    %25 = vector.broadcast %9 : vector<1x256xf32> to vector<32x256xf32>
    %26 = arith.addf %24, %25 : vector<32x256xf32>
    %27 = vector.extract_strided_slice %26 {offsets = [0, 0], sizes = [32, 128], strides = [1, 1]} : vector<32x256xf32> to vector<32x128xf32>
    %28 = vector.extract_strided_slice %26 {offsets = [0, 128], sizes = [32, 128], strides = [1, 1]} : vector<32x256xf32> to vector<32x128xf32>
    %cst_24 = arith.constant 5.000000e-01 : f32
    %29 = vector.broadcast %cst_24 : f32 to vector<32x128xf32>
    %30 = arith.mulf %29, %28 : vector<32x128xf32>
    %31 = math.exp %30 : vector<32x128xf32>
    %32 = arith.mulf %2, %31 : vector<32x128xf32>
    %33 = arith.addf %32, %27 : vector<32x128xf32>
    %34 = tpu.iota {dimensions = array<i32: 1>} : vector<32x128xi32>
    %c64_i32 = arith.constant 64 : i32
    %35 = vector.broadcast %c64_i32 : i32 to vector<32x128xi32>
    %36 = arith.cmpi slt, %34, %35 : vector<32x128xi32>
    %c96_i32 = arith.constant 96 : i32
    %37 = vector.broadcast %c96_i32 : i32 to vector<32x128xi32>
    %38 = arith.cmpi slt, %34, %37 : vector<32x128xi32>
    %cst_25 = arith.constant 0.000000e+00 : f32
    %39 = vector.broadcast %cst_25 : f32 to vector<32x128xf32>
    %40 = arith.select %38, %33, %39 : vector<32x128xi1>, vector<32x128xf32>
    %41 = arith.select %36, %27, %40 : vector<32x128xi1>, vector<32x128xf32>
    %42 = arith.truncf %41 : vector<32x128xf32> to vector<32x128xbf16>
    %c0_26 = arith.constant 0 : index
    %c0_27 = arith.constant 0 : index
    %43 = vector.load %arg12[%c0_26, %c0_27] : memref<32x128xbf16, #tpu.memory_space<vmem>>, vector<32x128xbf16>
    tpu.vector_store %arg12[%c0_26, %c0_27], %42 {strides = array<i32>} : memref<32x128xbf16, #tpu.memory_space<vmem>>, vector<32x128xbf16>,
    return
  }
  func.func @transform_0(%arg0: i32, %arg1: memref<1xi32, #tpu.memory_space<smem>>) -> (i32, i32) {
    %c0_i32 = arith.constant 0 : i32
    %c0_i32_0 = arith.constant 0 : i32
    return %arg0, %c0_i32 : i32, i32
  }
  func.func @transform_1(%arg0: i32, %arg1: memref<1xi32, #tpu.memory_space<smem>>) -> (i32, i32) {
    %c0_i32 = arith.constant 0 : i32
    %c0_i32_0 = arith.constant 0 : i32
    return %arg0, %c0_i32 : i32, i32
  }
  func.func @transform_2(%arg0: i32, %arg1: memref<1xi32, #tpu.memory_space<smem>>) -> (i32, i32) {
    %c0_i32 = arith.constant 0 : i32
    %c0_i32_0 = arith.constant 0 : i32
    return %arg0, %c0_i32 : i32, i32
  }
  func.func @transform_3(%arg0: i32, %arg1: memref<1xi32, #tpu.memory_space<smem>>) -> (i32, i32) {
    %c0_i32 = arith.constant 0 : i32
    %c0_i32_0 = arith.constant 0 : i32
    %c0_i32_1 = arith.constant 0 : i32
    return %c0_i32, %c0_i32_0 : i32, i32
  }
  func.func @transform_4(%arg0: i32, %arg1: memref<1xi32, #tpu.memory_space<smem>>) -> (i32, i32) {
    %c0_i32 = arith.constant 0 : i32
    %c0_i32_0 = arith.constant 0 : i32
    %c0_i32_1 = arith.constant 0 : i32
    return %c0_i32, %c0_i32_0 : i32, i32
  }
  func.func @transform_5(%arg0: i32, %arg1: memref<1xi32, #tpu.memory_space<smem>>) -> (i32, i32) {
    %c0_i32 = arith.constant 0 : i32
    %c0_i32_0 = arith.constant 0 : i32
    %c0_i32_1 = arith.constant 0 : i32
    return %c0_i32, %c0_i32_0 : i32, i32
  }
  func.func @transform_6(%arg0: i32, %arg1: memref<1xi32, #tpu.memory_space<smem>>) -> (i32, i32) {
    %c0_i32 = arith.constant 0 : i32
    %c0_i32_0 = arith.constant 0 : i32
    %c0_i32_1 = arith.constant 0 : i32
    return %c0_i32, %c0_i32_0 : i32, i32
  }
  func.func @transform_7(%arg0: i32, %arg1: memref<1xi32, #tpu.memory_space<smem>>) -> (i32, i32) {
    %c0_i32 = arith.constant 0 : i32
    %c0_i32_0 = arith.constant 0 : i32
    %c0_i32_1 = arith.constant 0 : i32
    return %c0_i32, %c0_i32_0 : i32, i32
  }
  func.func @transform_8(%arg0: i32, %arg1: memref<1xi32, #tpu.memory_space<smem>>) -> (i32, i32) {
    %c0_i32 = arith.constant 0 : i32
    %c0_i32_0 = arith.constant 0 : i32
    %c0_i32_1 = arith.constant 0 : i32
    return %c0_i32, %c0_i32_0 : i32, i32
  }
  func.func @transform_9(%arg0: i32, %arg1: memref<1xi32, #tpu.memory_space<smem>>) -> (i32, i32) {
    %c0_i32 = arith.constant 0 : i32
    %c0_i32_0 = arith.constant 0 : i32
    %c0_i32_1 = arith.constant 0 : i32
    return %c0_i32, %c0_i32_0 : i32, i32
  }
  func.func @transform_10(%arg0: i32, %arg1: memref<1xi32, #tpu.memory_space<smem>>) -> (i32, i32) {
    %c0_i32 = arith.constant 0 : i32
    %c0_i32_0 = arith.constant 0 : i32
    return %arg0, %c0_i32 : i32, i32
  }
}

</mosaic_0001>

<bundles_post_ra>
// kernel: tpu_custom_call.1
= control target key start
LH: loop header
LB: loop body
LE: loop exit
PB: predicated region body
PF: predicated region fallthrough
CT: control target
= control target key end

     0   :  { %s2199_s0 = inlined_call_operand.<no memory space> [shape: s32[1], index: 0, kind: input, shape index: {}]   ;;  %s2200_s1 = inlined_call_operand.vmem [shape: bf16[64,16], index: 1, kind: input, shape index: {}]   ;;  %s2201_s2 = inlined_call_operand.vmem [shape: bf16[64,16], index: 2, kind: input, shape index: {}]   ;;  %s2202_s3 = inlined_call_operand.vmem [shape: bf16[16,128], index: 3, kind: input, shape index: {}]   ;;  %s2203_s4 = inlined_call_operand.hbm [shape: bf16[16,128], index: 4, kind: input, shape index: {}]   ;;  %s2204_s5 = inlined_call_operand.vmem [shape: f32[1,128], index: 5, kind: input, shape index: {}]   ;;  %s2205_s6 = inlined_call_operand.vmem [shape: bf16[128,128], index: 6, kind: input, shape index: {}]   ;;  %s2206_s7 = inlined_call_operand.vmem [shape: f32[1,128], index: 7, kind: input, shape index: {}]   ;;  %s2207_s8 = inlined_call_operand.hbm [shape: bf16[128,256], index: 8, kind: input, shape index: {}]   ;;  %s2208_s9 = inlined_call_operand.vmem [shape: f32[1,256], index: 9, kind: input, shape index: {}]   ;;  %s2209_s10 = inlined_call_operand.hbm [shape: bf16[64,128], index: 10, kind: output, shape index: {}]  }
   0x1   :  { %2210 = sst [smem:[#allocation13_spill]] %s2203_s4 }
   0x2   :  { %15 = sst [smem:[#allocation3]] %s2199_s0 }
   0x3   :  { %16 = vsyncpa [#allocation5], 0 }
   0x4   :  { %17 = vsyncpa [#allocation8], 0 }
   0x5   :  { %18 = vsyncpa [#allocation6], 0 }
   0x6   :  { %20 = vsyncpa [#allocation6 + $0x1], 0  ;;  %s1791_s15 = smov 0   ;;  %s1793_s16 = smov 0  }
   0x7   :  { %s1795_s17 = smov 0   ;;  %s1797_s18 = smov 0  }
   0x8 LB: > { %s1812_s0 = sadd.s32 4294967295, %s1714_s18   ;;  %s1279_s19 = sadd.s32 4294967294, %s1714_s18   ;;  %s1714_s18 = sphi %s1797_s18, %s2222_s18   ;;  %s1710_s17 = sphi %s1795_s17, %s2221_s17   ;;  %s1706_s16 = sphi %s1793_s16, %s2220_s16   ;;  %s1702_s15 = sphi %s1791_s15, %s2219_s15  }
   0x9   : > { %s1816_s20 = sadd.s32 1, %s1714_s18   ;;  %s232_s21 = sadd.s32 1, %s1710_s17 }
   0xa   : > { %s229_s22 = ssub.s32 %s1714_s18, %s1816_s20  ;;  %p242_p0 = scmp.ne.s32.totalorder %s1710_s17, %s1706_s16 }
   0xb   : > { %p230_p1 = scmp.eq.s32.totalorder %s229_s22, 0  ;;  %p243_p2 = scmp.eq.s32.totalorder %s1812_s0, 1 }
   0xc   : > { %p248_p3 = scmp.ne.s32.totalorder %s1706_s16, %s1702_s15  ;;  %p249_p4 = scmp.eq.s32.totalorder %s1279_s19, 1 }
   0xd   : > { %s1827_s23 = scalar_select %p230_p1, %s1710_s17, %s232_s21  }
   0xe   : > { %p1829_p5 = por %p243_p2, %p242_p0  ;;  %p1833_p6 = por %p249_p4, %p248_p3 }
   0xf   : > { %p1280_p7 = scmp.ge.s32.totalorder %s1714_s18, 1  ;;  %p256_p8 = scmp.lt.s32.totalorder %s1714_s18, 3 }
  0x10   : > { %p1504_p9 = scmp.eq.s32.totalorder %s1812_s0, 0  ;;  %s2214_s4 = sld [smem:[#allocation13_spill]] }
  0x11   : > { %p1840_p10 = pnand %p1280_p7, %p256_p8  ;;  %s1716_s30 = smov [#allocation4]  }
  0x12   : > { %s272_s11 = sshll.u32 %s1716_s30, 4  ;;  %s293_s14 = sshll.u32 %s2207_s8, 4  ;;  %s273_s11 = int_to_ptr.vmem [resolvable:$true] %s272_s11  ;;  %s294_s14 = int_to_ptr.hbm [resolvable:$true] %s293_s14 }
  0x13   : > { %p1493_p11 = pneg %p1840_p10  ;;  %s1717_s19 = smov 64  }
  0x14   : > { %s1718_s21 = smov 4   ;;  %s1719_s22 = smov [#allocation7]  }
  0x15   : > { %p1494_p12 = pnand %p1504_p9, %p1493_p11  ;;  %s295_s27 = sshll.u32 %s1719_s22, 4  ;;  %s296_s27 = int_to_ptr.vmem [resolvable:$true] %s295_s27 }
  0x16   : > { %s270_s29 = sshll.u32 %s2214_s4, 4  ;;  %s1720_s28 = smov 128   ;;  %s271_s29 = int_to_ptr.hbm [resolvable:$true] %s270_s29 }
  0x17   : > { %1496 = dma.hbm_to_vmem [thread:$0]  (!%p1494_p12), %s271_s29, 128, %s273_s11, [#allocation5], %s1717_s19, %s1717_s19, %s1718_s21  }
  0x18   : > { %s1721_s4 = smov 8   ;;  %332 = sbr.rel (%p1840_p10) target bundleno = 503 (0x1f7), region = 56 }
  0x19   : > { %1499 = dma.hbm_to_vmem [thread:$0]  (!%p1494_p12), %s294_s14, 2048, %s296_s27, [#allocation8], %s1720_s28, %s1720_s28, %s1721_s4  }
  0x1d   : > { %1689 = dma.done.wait (%p1504_p9), [#allocation5], 128  }
  0x1e   : > { %1691 = vsyncadd (%p1504_p9), [#allocation5], 4294967168 }
  0x1f   : > { %1693 = dma.done.wait (%p1504_p9), [#allocation8], 2048  }
  0x20   : > { %1695 = vsyncadd (%p1504_p9), [#allocation8], 4294965248  ;;  %s1288_s29 = sshll.u32 %s1812_s0, 2  ;;  %v1438_v0 = vld [vmem:[#allocation4] sm:$0xff]  ;;  %vm848_vm0 = vcmask 130048   ;;  %v1446_v4 = vld [vmem:[%s2205_s6 + $0x38] sm:$0xff]  ;;  %v395_v13 = vlaneseq }
  0x21   : > { %p380_p13 = scmp.lt.s32.totalorder %s1288_s29, 7  ;;  %v1437_v1 = vld [vmem:[%s2202_s3] sm:$0xff]  ;;  %862 = vmatpush.bf16.msra.mxu0 %v1438_v0  ;;  %979 = vmatpush.bf16.msra.mxu2 %v1446_v4  ;;  %v1445_v5 = vld [vmem:[%s2205_s6 + $0x30] sm:$0xff]  ;;  %v1444_v6 = vld [vmem:[%s2205_s6 + $0x28] sm:$0xff]  ;;  %s393_s21 = sld [smem:[#allocation3]] }
  0x22   : > { %903 = vmatpush.bf16.msra.mxu1 %v1437_v1  ;;  %v1443_v7 = vld [vmem:[%s2205_s6 + $0x20] sm:$0xff]  ;;  %v1442_v10 = vld [vmem:[%s2205_s6 + $0x18] sm:$0xff]  ;;  %v1441_v11 = vld [vmem:[%s2205_s6 + $0x10] sm:$0xff]  ;;  %s376_s22 = sand.u32 1, %s1706_s16  }
  0x23   : > { %s2224_s29 = smov (!%p380_p13, %s1288_s29), 7  ;;  %v1440_v12 = vld [vmem:[%s2205_s6 + $0x8] sm:$0xff]  ;;  %v1439_v14 = vld [vmem:[%s2205_s6] sm:$0xff]  ;;  %v1422_v33 = vld [vmem:[#allocation7 + $0x70] sm:$0xf]  ;;  %s1287_s27 = sshll.u32 %s376_s22, 4 }
  0x24   : > { %s1289_s4 = sshll.u32 %s2224_s29, 2  ;;  %v1462_v34 = vld [vmem:[#allocation7 + $0x74] sm:$0xf0]  ;;  %v1461_v35 = vld [vmem:[#allocation7 + $0x74] sm:$0xf]  ;;  %s378_s28 = scalar_lea.vmem [#allocation9], %s1287_s27 }
  0x25   : > { %s389_s11 = scalar_lea.vmem %s2201_s2, %s1289_s4  ;;  %s383_s14 = scalar_lea.vmem %s2200_s1, %s1289_s4  ;;  %980 = vmatpush.bf16.msra.mxu2 %v1445_v5  ;;  %v1423_v37 = vor.u32 %v1462_v34, %v1422_v33  ;;  %v1424_v38 = vld [vmem:[#allocation7 + $0x78] sm:$0xf0]  ;;  %v1414_v39 = vld [vmem:[#allocation7 + $0x60] sm:$0xf]  ;;  %v1460_v40 = vld [vmem:[#allocation7 + $0x64] sm:$0xf0] }
  0x26   : > { %v1435_v2 = vld [vmem:[%s389_s11] sm:$0xff]  ;;  %v1436_v8 = vld [vmem:[%s389_s11 + $0x8] sm:$0xff]  ;;  %v1427_v41 = vor.u32 %v1461_v35, %v1424_v38  ;;  %v1416_v43 = vld [vmem:[#allocation7 + $0x68] sm:$0xf0]  ;;  %v1415_v46 = vor.u32 %v1460_v40, %v1414_v39  ;;  %s1463_s29 = sshll.u32 %s1812_s0, 4  ;;  %s1180_s30 = sshll.u32 %s378_s28, 4  ;;  %s1181_s30 = int_to_ptr.vmem [resolvable:$true] %s1180_s30 }
  0x27   : > { %v1433_v3 = vld [vmem:[%s383_s14] sm:$0xff]  ;;  %1316 = vmatmul.msk.bf16.vlgmr.msra.gmra.mxu0 %vm848_vm0, %v1435_v2  ;;  %v1434_v9 = vld [vmem:[%s383_s14 + $0x8] sm:$0xff]  ;;  %s394_s4 = sadd.s32 %s1812_s0, %s393_s21  ;;  %1089 = vmatpush.bf16.msra.mxu3 %v1423_v37  ;;  %v1406_v48 = vld [vmem:[#allocation7 + $0x50] sm:$0xf]  ;;  %s1179_s14 = scalar_lea.hbm %s2209_s10, %s1463_s29 }
  0x28   : > { %1330 = vmatmul.msk.bf16.vlgmr.msra.gmra.mxu1 %vm848_vm0, %v1433_v3  ;;  %v1899_v15 = vstv %s394_s4  ;;  %v1459_v42 = vld [vmem:[#allocation7 + $0x64] sm:$0xf]  ;;  %v1558_v45 = vld [vmem:[%s2204_s5] ss:$0 sm:$0xff]  ;;  %1108 = vmatpush.bf16.msrb.mxu0 %v1427_v41  ;;  %v1457_v52 = vld [vmem:[#allocation7 + $0x54] sm:$0xf] }
  0x29   : > { %981 = vmatpush.bf16.msra.mxu2 %v1444_v6  ;;  %v399_v16 = vadd.s32 %v1899_v15, %v395_v13  ;;  %v1419_v47 = vor.u32 %v1459_v42, %v1416_v43  ;;  %v1458_v49 = vld [vmem:[#allocation7 + $0x54] sm:$0xf0]  ;;  %1475 = vmatpush.bf16.msrb.mxu1 %v1427_v41  ;;  %v397_v50 = vxor.u32 %v1899_v15, %v1899_v15  ;;  %v1408_v53 = vld [vmem:[#allocation7 + $0x58] sm:$0xf0]  ;;  %v1398_v62 = vld [vmem:[#allocation7 + $0x40] sm:$0xf] }
  0x2a   : > { %v1407_v59 = vor.u32 %v1458_v49, %v1406_v48  ;;  %v1411_v61 = vor.u32 %v1457_v52, %v1408_v53  ;;  %v1456_v63 = vld [vmem:[#allocation7 + $0x44] sm:$0xf0]  ;;  %v1455_v2 = vld [vmem:[#allocation7 + $0x44] sm:$0xf]  ;;  %v1400_v3 = vld [vmem:[#allocation7 + $0x48] sm:$0xf0] }
  0x2b   : > { %v401_v17 = vshll.u32 %v399_v16, 13  ;;  %v402_v18 = vshrl.u32 %v399_v16, 19  ;;  %v400_v19 = vadd.s32 %v399_v16, %v399_v16  ;;  %1090 = vmatpush.bf16.msra.mxu3 %v1415_v46  ;;  %v1908_v0 = vxor.u32 466688986, %v397_v50  ;;  %s1182_s26 = sshll.u32 %s1179_s14, 4  ;;  %s1168_s0 = scalar_lea.sflag [#allocation6], %s376_s22  ;;  %s1183_s26 = int_to_ptr.hbm [resolvable:$true] %s1182_s26 }
  0x2c   : > { %1109 = vmatpush.bf16.msrb.mxu0 %v1419_v47  ;;  %s1658_s12 = sshra.s32 %s1183_s26, 4  ;;  %s1664_s27 = scalar_lea.hbm %s2209_s10, 32  ;;  %s1659_s12 = int_to_ptr.hbm [resolvable:$true] %s1658_s12 }
  0x2d   : > { %982 = vmatpush.bf16.msra.mxu2 %v1443_v7  ;;  %v403_v20 = vor.u32 %v402_v18, %v401_v17  ;;  %1476 = vmatpush.bf16.msrb.mxu1 %v1419_v47  ;;  %v1399_v7 = vor.u32 %v1456_v63, %v1398_v62  ;;  %s1660_s13 = scalar_lea.hbm %s1659_s12, 16  ;;  %p1665_p3 = scmp.lt.s32.totalorder %s1659_s12, %s2209_s10 }
  0x2e   : > { %p1661_p0 = scmp.ne.s32.totalorder %s1659_s12, %s1660_s13  ;;  %p1666_p4 = scmp.lt.s32.totalorder %s1664_s27, %s1660_s13 }
  0x2f   : > { %v404_v21 = vxor.u32 %v403_v20, %v400_v19  ;;  %1091 = vmatpush.bf16.msra.mxu3 %v1407_v59 }
  0x30   : > { %1110 = vmatpush.bf16.msrb.mxu0 %v1411_v61  ;;  %p1662_p1 = pnand %p1661_p0, %p1829_p5  ;;  %p1667_p7 = por %p1666_p4, %p1665_p3 }
  0x31   : > { %983 = vmatpush.bf16.msra.mxu2 %v1442_v10  ;;  %v406_v22 = vshll.u32 %v404_v21, 15  ;;  %v407_v23 = vshrl.u32 %v404_v21, 17  ;;  %v405_v24 = vadd.s32 %v404_v21, %v400_v19  ;;  %1477 = vmatpush.bf16.msrb.mxu1 %v1411_v61 }
  0x32   : > { %p1663_p2 = pneg %p1662_p1 }
  0x33   : > { %v408_v25 = vor.u32 %v407_v23, %v406_v22  ;;  %1092 = vmatpush.bf16.msra.mxu3 %v1399_v7 }
  0x34   : > { %p1668_p8 = pnand %p1667_p7, %p1663_p2 }
  0x35   : > { %984 = vmatpush.bf16.msra.mxu2 %v1441_v11  ;;  %v409_v26 = vxor.u32 %v408_v25, %v405_v24 }
  0x37   : > { %1317 = vmatmul.msk.bf16.gmra.mxu0 %vm848_vm0, %v1436_v8  ;;  %v411_v27 = vshll.u32 %v409_v26, 26  ;;  %v412_v28 = vshrl.u32 %v409_v26, 6  ;;  %v410_v29 = vadd.s32 %v409_v26, %v405_v24 }
  0x38   : > { %1331 = vmatmul.msk.bf16.gmra.mxu1 %vm848_vm0, %v1434_v9  ;;  %v1403_v9 = vor.u32 %v1455_v2, %v1400_v3 }
  0x39   : > { %985 = vmatpush.bf16.msra.mxu2 %v1440_v12  ;;  %v413_v30 = vor.u32 %v412_v28, %v411_v27 }
  0x3a   : > { %1111 = vmatpush.bf16.msrb.mxu0 %v1403_v9  ;;  %1478 = vmatpush.bf16.msrb.mxu1 %v1403_v9 }
  0x3b   : > { %v414_v36 = vxor.u32 %v413_v30, %v410_v29 }
  0x3d   : > { %986 = vmatpush.bf16.msra.mxu2 %v1439_v14  ;;  %v416_v51 = vshll.u32 %v414_v36, 6  ;;  %v415_v54 = vadd.s32 %v414_v36, %v410_v29  ;;  %v417_v55 = vshrl.u32 %v414_v36, 26 }
  0x3f   : > { %v418_v1 = vor.u32 %v417_v55, %v416_v51  ;;  %v420_v10 = vadd.s32 %v415_v54, %v1899_v15 }
  0x41   : > { %v419_v5 = vxor.u32 %v418_v1, %v415_v54 }
  0x43   : > { %v421_v11 = vadd.s32 %v419_v5, %v1908_v0 }
  0x45   : > { %v422_v14 = vadd.s32 1, %v421_v11 }
  0x47   : > { %v423_v18 = vadd.s32 %v422_v14, %v420_v10  ;;  %v424_v19 = vshll.u32 %v422_v14, 17  ;;  %v425_v20 = vshrl.u32 %v422_v14, 15 }
  0x49   : > { %v426_v21 = vor.u32 %v425_v20, %v424_v19 }
  0x4b   : > { %v427_v23 = vxor.u32 %v426_v21, %v423_v18 }
  0x4d   : > { %v428_v24 = vadd.s32 %v427_v23, %v423_v18  ;;  %v429_v25 = vshll.u32 %v427_v23, 29  ;;  %v430_v26 = vshrl.u32 %v427_v23, 3 }
  0xa4   : > { %v864_v31 = vpop.f32.mrf.mxu0 }
  0xa5   : > { %v905_v32 = vpop.f32.mrf.mxu1 }
  0xa6   : > { %v906_v44 = vadd.f32 %v905_v32, %v864_v31  ;;  %v431_v31 = vor.u32 %v430_v26, %v429_v25 }
  0xa8   : > { %v918_v56 = vadd.f32 %v1558_v45, %v906_v44  ;;  %v432_v33 = vxor.u32 %v431_v31, %v428_v24 }
  0xaa   : > { %v922_v6 = vmax.f32 %v918_v56, 0.0  ;;  %v433_v36 = vadd.s32 %v432_v33, %v428_v24  ;;  %v434_v37 = vshll.u32 %v432_v33, 16  ;;  %v435_v38 = vshrl.u32 %v432_v33, 16 }
  0xac   : > { %v866_v57 = vpop.f32.mrf.mxu0  ;;  %v436_v40 = vor.u32 %v435_v38, %v434_v37 }
  0xad   : > { %v907_v58 = vpop.f32.mrf.mxu1 }
  0xae   : > { %v908_v60 = vadd.f32 %v907_v58, %v866_v57  ;;  %v437_v41 = vxor.u32 %v436_v40, %v433_v36 }
  0xb0   : > { %v919_v4 = vadd.f32 %v1558_v45, %v908_v60  ;;  %v438_v42 = vadd.s32 %v437_v41, %v433_v36  ;;  %v439_v43 = vshll.u32 %v437_v41, 24  ;;  %v440_v44 = vshrl.u32 %v437_v41, 8 }
  0xb2   : > { %v923_v8 = vmax.f32 %v919_v4, 0.0  ;;  %v441_v46 = vor.u32 %v440_v44, %v439_v43  ;;  %v443_v48 = vadd.s32 %v438_v42, %v1908_v0 }
  0xb4   : > { %v926_v12 = vpack.c.bf16 %v923_v8, %v922_v6  ;;  %v869_v16 = vpop.f32.mrf.mxu0  ;;  %v442_v47 = vxor.u32 %v441_v46, %v438_v42  ;;  %v1390_v46 = vld [vmem:[#allocation7 + $0x30] sm:$0xf] }
  0xb5   : > { %v910_v17 = vpop.f32.mrf.mxu1 }
  0xb6   : > { %987 = vmatmul.bf16.vlgmr.msra.gmra.mxu2 %v926_v12  ;;  %v911_v22 = vadd.f32 %v910_v17, %v869_v16  ;;  %v444_v49 = vadd.s32 %v442_v47, %v1899_v15  ;;  %v1454_v47 = vld [vmem:[#allocation7 + $0x34] sm:$0xf0] }
  0xb8   : > { %v920_v27 = vadd.f32 %v1558_v45, %v911_v22 }
  0xba   : > { %v924_v34 = vmax.f32 %v920_v27, 0.0 }
  0xbc   : > { %v871_v28 = vpop.f32.mrf.mxu0 }
  0xbd   : > { %v912_v29 = vpop.f32.mrf.mxu1 }
  0xbe   : > { %v913_v30 = vadd.f32 %v912_v29, %v871_v28 }
  0xc0   : > { %v921_v32 = vadd.f32 %v1558_v45, %v913_v30  ;;  %v445_v45 = vadd.s32 2, %v444_v49  ;;  %v1391_v49 = vor.u32 %v1454_v47, %v1390_v46 }
  0xc2   : > { %v925_v35 = vmax.f32 %v921_v32, 0.0  ;;  %v446_v50 = vadd.s32 %v445_v45, %v443_v48  ;;  %v447_v51 = vshll.u32 %v445_v45, 13  ;;  %v448_v52 = vshrl.u32 %v445_v45, 19  ;;  %v1453_v48 = vld [vmem:[#allocation7 + $0x34] sm:$0xf]  ;;  %1093 = vmatpush.bf16.msra.mxu3 %v1391_v49 }
  0xc3   : > { %v1392_v45 = vld [vmem:[#allocation7 + $0x38] sm:$0xf0] }
  0xc4   : > { %v927_v39 = vpack.c.bf16 %v925_v35, %v924_v34  ;;  %v449_v53 = vor.u32 %v448_v52, %v447_v51 }
  0xc6   : > { %992 = vmatmul.bf16.gmra.mxu2 %v927_v39  ;;  %v450_v54 = vxor.u32 %v449_v53, %v446_v50  ;;  %v1395_v53 = vor.u32 %v1453_v48, %v1392_v45 }
  0xc8   : > { %v451_v55 = vadd.s32 %v450_v54, %v446_v50  ;;  %v452_v56 = vshll.u32 %v450_v54, 15  ;;  %v453_v57 = vshrl.u32 %v450_v54, 17  ;;  %1112 = vmatpush.bf16.msrb.mxu0 %v1395_v53  ;;  %1479 = vmatpush.bf16.msrb.mxu1 %v1395_v53 }
  0xca   : > { %v454_v58 = vor.u32 %v453_v57, %v452_v56  ;;  %v1452_v56 = vld [vmem:[#allocation7 + $0x24] sm:$0xf0]  ;;  %v1451_v57 = vld [vmem:[#allocation7 + $0x24] sm:$0xf] }
  0xcc   : > { %v455_v59 = vxor.u32 %v454_v58, %v451_v55 }
  0xce   : > { %v456_v60 = vadd.s32 %v455_v59, %v451_v55  ;;  %v457_v61 = vshll.u32 %v455_v59, 26  ;;  %v458_v62 = vshrl.u32 %v455_v59, 6  ;;  %v1382_v55 = vld [vmem:[#allocation7 + $0x20] sm:$0xf]  ;;  %v1384_v59 = vld [vmem:[#allocation7 + $0x28] sm:$0xf0] }
  0xcf   : > { %v1383_v58 = vor.u32 %v1452_v56, %v1382_v55 }
  0xd0   : > { %v459_v63 = vor.u32 %v458_v62, %v457_v61  ;;  %v1387_v61 = vor.u32 %v1451_v57, %v1384_v59 }
  0xd1   : > { %1094 = vmatpush.bf16.msra.mxu3 %v1383_v58 }
  0xd2   : > { %v460_v1 = vxor.u32 %v459_v63, %v456_v60  ;;  %1113 = vmatpush.bf16.msrb.mxu0 %v1387_v61  ;;  %1480 = vmatpush.bf16.msrb.mxu1 %v1387_v61 }
  0xd4   : > { %v461_v2 = vadd.s32 %v460_v1, %v456_v60  ;;  %v462_v3 = vshll.u32 %v460_v1, 6  ;;  %v463_v4 = vshrl.u32 %v460_v1, 26 }
  0xd6   : > { %v464_v5 = vor.u32 %v463_v4, %v462_v3  ;;  %v466_v7 = vadd.s32 %v461_v2, %v1899_v15  ;;  %v1450_v3 = vld [vmem:[#allocation7 + $0x14] sm:$0xf0]  ;;  %v1449_v4 = vld [vmem:[#allocation7 + $0x14] sm:$0xf] }
  0xd8   : > { %v465_v6 = vxor.u32 %v464_v5, %v461_v2  ;;  %v1374_v2 = vld [vmem:[#allocation7 + $0x10] sm:$0xf] }
  0xd9   : > { %v1375_v5 = vor.u32 %v1450_v3, %v1374_v2 }
  0xda   : > { %v467_v8 = vadd.s32 %v465_v6, %v1899_v15  ;;  %v1376_v6 = vld [vmem:[#allocation7 + $0x18] sm:$0xf0] }
  0xdb   : > { %1095 = vmatpush.bf16.msra.mxu3 %v1375_v5 }
  0xdc   : > { %v468_v9 = vadd.s32 3, %v467_v8  ;;  %v1379_v8 = vor.u32 %v1449_v4, %v1376_v6 }
  0xde   : > { %v469_v10 = vadd.s32 %v468_v9, %v466_v7  ;;  %v470_v11 = vshll.u32 %v468_v9, 17  ;;  %v471_v12 = vshrl.u32 %v468_v9, 15  ;;  %1114 = vmatpush.bf16.msrb.mxu0 %v1379_v8  ;;  %1481 = vmatpush.bf16.msrb.mxu1 %v1379_v8 }
  0xe0   : > { %v472_v14 = vor.u32 %v471_v12, %v470_v11  ;;  %v1448_v11 = vld [vmem:[#allocation7 + $0x4] sm:$0xf0]  ;;  %v1447_v12 = vld [vmem:[#allocation7 + $0x4] sm:$0xf] }
  0xe2   : > { %v473_v16 = vxor.u32 %v472_v14, %v469_v10 }
  0xe4   : > { %v474_v17 = vadd.s32 %v473_v16, %v469_v10  ;;  %v475_v18 = vshll.u32 %v473_v16, 29  ;;  %v476_v19 = vshrl.u32 %v473_v16, 3  ;;  %v1366_v10 = vld [vmem:[#allocation7] sm:$0xf] }
  0xe6   : > { %v477_v20 = vor.u32 %v476_v19, %v475_v18  ;;  %v1368_v18 = vld [vmem:[#allocation7 + $0x8] sm:$0xf0] }
  0xe7   : > { %v1371_v19 = vor.u32 %v1447_v12, %v1368_v18 }
  0xe8   : > { %v478_v21 = vxor.u32 %v477_v20, %v474_v17 }
  0xe9   : > { %1115 = vmatpush.bf16.msrb.mxu0 %v1371_v19  ;;  %1482 = vmatpush.bf16.msrb.mxu1 %v1371_v19 }
  0xea   : > { %v479_v22 = vadd.s32 %v478_v21, %v474_v17  ;;  %v480_v23 = vshll.u32 %v478_v21, 16  ;;  %v481_v24 = vshrl.u32 %v478_v21, 16  ;;  %v1367_v17 = vor.u32 %v1448_v11, %v1366_v10 }
  0xec   : > { %v482_v25 = vor.u32 %v481_v24, %v480_v23  ;;  %1096 = vmatpush.bf16.msra.mxu3 %v1367_v17 }
  0xee   : > { %v483_v26 = vxor.u32 %v482_v25, %v479_v22 }
  0xf0   : > { %v484_v27 = vadd.s32 %v483_v26, %v479_v22  ;;  %v485_v28 = vshll.u32 %v483_v26, 24  ;;  %v486_v29 = vshrl.u32 %v483_v26, 8 }
  0xf2   : > { %v487_v30 = vor.u32 %v486_v29, %v485_v28  ;;  %v489_v32 = vadd.s32 %v484_v27, %v1899_v15 }
  0xf4   : > { %v488_v31 = vxor.u32 %v487_v30, %v484_v27 }
  0xf6   : > { %v490_v33 = vadd.s32 %v488_v31, %v1908_v0 }
  0xf8   : > { %v491_v34 = vadd.s32 4, %v490_v33 }
  0xfa   : > { %v492_v35 = vadd.s32 %v491_v34, %v489_v32  ;;  %v493_v36 = vshll.u32 %v491_v34, 13  ;;  %v494_v37 = vshrl.u32 %v491_v34, 19 }
  0xfc   : > { %v495_v38 = vor.u32 %v494_v37, %v493_v36  ;;  %v1559_v37 = vld [vmem:[%s2206_s7] ss:$0 sm:$0xff] }
  0xfe   : > { %v496_v39 = vxor.u32 %v495_v38, %v492_v35 }
 0x100   : > { %v497_v40 = vadd.s32 %v496_v39, %v492_v35  ;;  %v498_v41 = vshll.u32 %v496_v39, 15  ;;  %v499_v42 = vshrl.u32 %v496_v39, 17 }
 0x102   : > { %v500_v43 = vor.u32 %v499_v42, %v498_v41 }
 0x104   : > { %v501_v44 = vxor.u32 %v500_v43, %v497_v40 }
 0x106   : > { %v502_v50 = vadd.s32 %v501_v44, %v497_v40  ;;  %v503_v51 = vshll.u32 %v501_v44, 26  ;;  %v504_v52 = vshrl.u32 %v501_v44, 6 }
 0x108   : > { %v505_v54 = vor.u32 %v504_v52, %v503_v51 }
 0x10a   : > { %v506_v60 = vxor.u32 %v505_v54, %v502_v50 }
 0x10c   : > { %v507_v62 = vadd.s32 %v506_v60, %v502_v50  ;;  %v508_v63 = vshll.u32 %v506_v60, 6  ;;  %v509_v1 = vshrl.u32 %v506_v60, 26 }
 0x10e   : > { %v510_v7 = vor.u32 %v509_v1, %v508_v63  ;;  %v512_v14 = vadd.s32 %v507_v62, %v1908_v0 }
 0x110   : > { %v511_v9 = vxor.u32 %v510_v7, %v507_v62 }
 0x112   : > { %v513_v16 = vadd.s32 %v511_v9, %v1899_v15 }
 0x114   : > { %v514_v20 = vadd.s32 5, %v513_v16 }
 0x116   : > { %v515_v21 = vxor.u32 %v514_v20, %v512_v14 }
 0x118   : > { %516 = set.rngseed %v515_v21 }
 0x119   : > { %v517_v22 = vrng }
 0x11a   : > { %v521_v23 = vshrl.u32 %v517_v22, 9  ;;  %v518_v24 = vrng }
 0x11b   : > { %v522_v25 = vshrl.u32 %v518_v24, 9  ;;  %v519_v0 = vrng }
 0x11c   : > { %v525_v26 = vor.u32 1065353216, %v521_v23  ;;  %v523_v31 = vshrl.u32 %v519_v0, 9  ;;  %v520_v34 = vrng }
 0x11d   : > { %v526_v28 = vor.u32 1065353216, %v522_v25  ;;  %v524_v39 = vshrl.u32 %v520_v34, 9 }
 0x11e   : > { %v1292_v27 = vadd.f32 -1.0, %v525_v26  ;;  %v527_v36 = vor.u32 1065353216, %v523_v31 }
 0x11f   : > { %v1293_v30 = vadd.f32 -1.0, %v526_v28  ;;  %v528_v44 = vor.u32 1065353216, %v524_v39 }
 0x120   : > { %v537_v29 = vmul.f32 2.0, %v1292_v27  ;;  %v1294_v41 = vadd.f32 -1.0, %v527_v36 }
 0x121   : > { %v538_v32 = vmul.f32 2.0, %v1293_v30  ;;  %v1295_v52 = vadd.f32 -1.0, %v528_v44 }
 0x122   : > { %v541_v15 = vadd.f32 -0.99999994, %v537_v29  ;;  %v539_v49 = vmul.f32 2.0, %v1294_v41 }
 0x123   : > { %v542_v38 = vadd.f32 -0.99999994, %v538_v32  ;;  %v540_v57 = vmul.f32 2.0, %v1295_v52 }
 0x124   : > { %v1920_v35 = vmax.f32 %v541_v15, -0.99999994  ;;  %v543_v54 = vadd.f32 -0.99999994, %v539_v49 }
 0x125   : > { %v1926_v43 = vmax.f32 %v542_v38, -0.99999994  ;;  %v544_v62 = vadd.f32 -0.99999994, %v540_v57 }
 0x126   : > { %v549_v40 = vsub.f32 0.0, %v1920_v35  ;;  %v1931_v59 = vmax.f32 %v543_v54, -0.99999994 }
 0x127   : > { %v550_v51 = vsub.f32 0.0, %v1926_v43  ;;  %v1934_v4 = vmax.f32 %v544_v62, -0.99999994 }
 0x128   : > { %v553_v48 = vmul.f32 %v549_v40, %v1920_v35  ;;  %v551_v63 = vsub.f32 0.0, %v1931_v59 }
 0x129   : > { %v554_v56 = vmul.f32 %v550_v51, %v1926_v43  ;;  %v552_v12 = vsub.f32 0.0, %v1934_v4 }
 0x12a   : > { %v557_v53 = vadd.f32 1.0, %v553_v48  ;;  %v560_v60 = vmul.f32 -0.5, %v553_v48  ;;  %v563_v3 = vand.u32 2147483647, %v553_v48  ;;  %v555_v8 = vmul.f32 %v551_v63, %v1931_v59 }
 0x12b   : > { %v566_v61 = vadd.f32 1.0, %v554_v56  ;;  %v569_v6 = vmul.f32 -0.5, %v554_v56  ;;  %v572_v19 = vand.u32 2147483647, %v554_v56  ;;  %v556_v23 = vmul.f32 %v552_v12, %v1934_v4 }
 0x12c   : > { %1560 = vlog2.f32 %v557_v53  ;;  %v561_v1 = vadd.f32 1.0, %v560_v60  ;;  %vm564_vm1 = vcmp.lt.f32.partialorder %v563_v3, 0.0004427343  ;;  %v575_v20 = vadd.f32 1.0, %v555_v8 }
 0x12d   : > { %1562 = vlog2.f32 %v566_v61  ;;  %v570_v17 = vadd.f32 1.0, %v569_v6  ;;  %vm573_vm2 = vcmp.lt.f32.partialorder %v572_v19, 0.0004427343  ;;  %v578_v27 = vmul.f32 -0.5, %v555_v8 }
 0x12e   : > { %v562_v11 = vmul.f32 %v561_v1, %v553_v48  ;;  %1564 = vlog2.f32 %v575_v20  ;;  %v584_v28 = vadd.f32 1.0, %v556_v23  ;;  %v581_v31 = vand.u32 2147483647, %v555_v8 }
 0x12f   : > { %v571_v25 = vmul.f32 %v570_v17, %v554_v56  ;;  %v579_v0 = vadd.f32 1.0, %v578_v27  ;;  %v587_v32 = vmul.f32 -0.5, %v556_v23  ;;  %v590_v39 = vand.u32 2147483647, %v556_v23 }
 0x130   : > { %vm582_vm3 = vcmp.lt.f32.partialorder %v581_v31, 0.0004427343  ;;  %v1722_v20 = vmov -0.00020021426  }
 0x131   : > { %v580_v34 = vmul.f32 %v579_v0, %v555_v8  ;;  %vm591_vm4 = vcmp.lt.f32.partialorder %v590_v39, 0.0004427343 }
 0x132   : > { %v1561_v2 = vpop.eup %1560 }
 0x133   : > { %v559_v10 = vmul.f32 0.6931472, %v1561_v2  ;;  %v1563_v18 = vpop.eup %1562 }
 0x134   : > { %v568_v24 = vmul.f32 0.6931472, %v1563_v18  ;;  %v1565_v30 = vpop.eup %1564 }
 0x135   : > { %v565_v22 = vsel %vm564_vm1, %v562_v11, %v559_v10 }
 0x136   : > { %v1939_v26 = vsub.f32 0.0, %v565_v22  ;;  %v574_v29 = vsel %vm573_vm2, %v571_v25, %v568_v24 }
 0x137   : > { %v1942_v15 = vsub.f32 0.0, %v574_v29 }
 0x138   : > { %1566 = vrsqrt.f32 %v1939_v26  ;;  %vm612_vm5 = vcmp.eq.f32.partialorder %v1939_v26, inf  ;;  %v615_v2 = vand.u32 2147483648, %v1939_v26  ;;  %vm614_vm6 = vcmp.eq.f32.partialorder %v1939_v26, 0.0 }
 0x139   : > { %v988_v33 = vpop.f32.mrf.mxu2  ;;  %1568 = vlog2.f32 %v584_v28  ;;  %vm624_vm7 = vcmp.eq.f32.partialorder %v1942_v15, inf  ;;  %vm626_vm8 = vcmp.eq.f32.partialorder %v1942_v15, 0.0  ;;  %v627_v10 = vand.u32 2147483648, %v1942_v15 }
 0x13a   : > { %v989_v42 = vadd.f32 %v1559_v37, %v988_v33  ;;  %v577_v33 = vmul.f32 0.6931472, %v1565_v30  ;;  %1570 = vrsqrt.f32 %v1942_v15  ;;  %v1296_v11 = vadd.f32 -2.5, %v1939_v26 }
 0x13b   : > { %vm597_vm9 = vcmp.lt.f32.partialorder %v1939_v26, 5.0  ;;  %vm598_vm10 = vcmp.lt.f32.partialorder %v1942_v15, 5.0  ;;  %v1723_v28 = vmov 0.00010095056  }
 0x13c   : > { %v998_v45 = vmax.f32 %v989_v42, 0.0  ;;  %v583_v40 = vsel %vm582_vm3, %v580_v34, %v577_v33  ;;  %v665_v29 = vsel %vm597_vm9, 3.4327394e-07, %v1723_v28  ;;  %v666_v39 = vsel %vm598_vm10, 3.4327394e-07, %v1723_v28 }
 0x13e   : > { %v1567_v36 = vpop.eup %1566 }
 0x13f   : > { %v1569_v38 = vpop.eup %1568  ;;  %v606_v41 = vmul.f32 %v1567_v36, %v1939_v26 }
 0x140   : > { %v586_v42 = vmul.f32 0.6931472, %v1569_v38 }
 0x141   : > { %v990_v46 = vpop.f32.mrf.mxu2  ;;  %v607_v48 = vmul.f32 %v1567_v36, %v606_v41 }
 0x142   : > { %v991_v47 = vadd.f32 %v1559_v37, %v990_v46  ;;  %v1571_v46 = vpop.eup %1570 }
 0x144   : > { %v999_v50 = vmax.f32 %v991_v47, 0.0  ;;  %v1946_v47 = vsub.f32 0.0, %v583_v40 }
 0x146   : > { %v1002_v55 = vpack.c.bf16 %v999_v50, %v998_v45  ;;  %v618_v45 = vmul.f32 %v1571_v46, %v1942_v15  ;;  %1572 = vrsqrt.f32 %v1946_v47  ;;  %v608_v50 = vmul.f32 0.5, %v607_v48 }
 0x147   : > { %vm636_vm11 = vcmp.eq.f32.partialorder %v1946_v47, inf  ;;  %v639_v30 = vand.u32 2147483648, %v1946_v47  ;;  %vm638_vm12 = vcmp.eq.f32.partialorder %v1946_v47, 0.0  ;;  %v1298_v41 = vadd.f32 -2.5, %v1946_v47 }
 0x148   : > { %1097 = vmatmul.bf16.vlgmr.msra.gmra.mxu3 %v1002_v55  ;;  %1116 = vmatmul.bf16.vlgmr.msrb.gmra.mxu0 %v1002_v55  ;;  %v619_v52 = vmul.f32 %v1571_v46, %v618_v45  ;;  %v609_v53 = vsub.f32 1.5, %v608_v50  ;;  %vm599_vm15 = vcmp.lt.f32.partialorder %v1946_v47, 5.0 }
 0x149   : > { %v993_v58 = vpop.f32.mrf.mxu2 }
 0x14a   : > { %v994_v5 = vadd.f32 %v1559_v37, %v993_v58  ;;  %v620_v55 = vmul.f32 0.5, %v619_v52  ;;  %v610_v56 = vmul.f32 %v1567_v36, %v609_v53 }
 0x14c   : > { %v1000_v14 = vmax.f32 %v994_v5, 0.0  ;;  %v1573_v54 = vpop.eup %1572  ;;  %v621_v58 = vsub.f32 1.5, %v620_v55  ;;  %v611_v61 = vmul.f32 %v610_v56, %v1939_v26 }
 0x14d   : > { %v630_v57 = vmul.f32 %v1573_v54, %v1946_v47 }
 0x14e   : > { %v622_v63 = vmul.f32 %v1571_v46, %v621_v58  ;;  %v613_v3 = vsel %vm612_vm5, %v1939_v26, %v611_v61 }
 0x14f   : > { %v631_v62 = vmul.f32 %v1573_v54, %v630_v57  ;;  %v616_v8 = vsel %vm614_vm6, %v615_v2, %v613_v3 }
 0x150   : > { %v623_v6 = vmul.f32 %v622_v63, %v1942_v15  ;;  %v1300_v12 = vadd.f32 -3.0, %v616_v8 }
 0x151   : > { %v995_v7 = vpop.f32.mrf.mxu2  ;;  %v632_v5 = vmul.f32 0.5, %v631_v62  ;;  %v1725_v62 = vmov -0.0036734284  }
 0x152   : > { %v996_v9 = vadd.f32 %v1559_v37, %v995_v7  ;;  %v588_v37 = vadd.f32 1.0, %v587_v32  ;;  %v1969_v19 = vsel %vm597_vm9, %v1296_v11, %v1300_v12  ;;  %v662_v32 = vsel %vm598_vm10, 2.8102264e-08, %v1722_v20 }
 0x153   : > { %v689_v63 = vsel %vm597_vm9, -4.3915065e-06, %v1725_v62 }
 0x154   : > { %v1001_v16 = vmax.f32 %v996_v9, 0.0  ;;  %v589_v44 = vmul.f32 %v588_v37, %v556_v23  ;;  %v633_v9 = vsub.f32 1.5, %v632_v5  ;;  %v1297_v23 = vadd.f32 -2.5, %v1942_v15 }
 0x156   : > { %v1003_v21 = vpack.c.bf16 %v1001_v16, %v1000_v14  ;;  %v592_v49 = vsel %vm591_vm4, %v589_v44, %v586_v42  ;;  %v625_v14 = vsel %vm624_vm7, %v1942_v15, %v623_v6  ;;  %v634_v17 = vmul.f32 %v1573_v54, %v633_v9 }
 0x157   : > { %v1950_v51 = vsub.f32 0.0, %v592_v49  ;;  %v628_v18 = vsel %vm626_vm8, %v627_v10, %v625_v14  ;;  %v1724_v44 = vmov 0.0013493432   ;;  %v663_v54 = vsel %vm599_vm15, 2.8102264e-08, %v1722_v20 }
 0x158   : > { %1102 = vmatmul.bf16.gmra.mxu3 %v1003_v21  ;;  %1121 = vmatmul.bf16.vlgmr.msrb.gmra.mxu1 %v1003_v21  ;;  %v661_v21 = vsel %vm597_vm9, 2.8102264e-08, %v1722_v20  ;;  %v1301_v24 = vadd.f32 -3.0, %v628_v18  ;;  %v635_v25 = vmul.f32 %v634_v17, %v1946_v47  ;;  %v677_v46 = vsel %vm597_vm9, -3.5233877e-06, %v1724_v44 }
 0x159   : > { %1574 = vrsqrt.f32 %v1950_v51  ;;  %v669_v27 = vmul.f32 %v661_v21, %v1969_v19  ;;  %vm648_vm13 = vcmp.eq.f32.partialorder %v1950_v51, inf  ;;  %v651_v42 = vand.u32 2147483648, %v1950_v51 }
 0x15a   : > { %v1983_v31 = vsel %vm598_vm10, %v1297_v23, %v1301_v24  ;;  %v637_v33 = vsel %vm636_vm11, %v1946_v47, %v635_v25  ;;  %vm650_vm14 = vcmp.eq.f32.partialorder %v1950_v51, 0.0  ;;  %v678_v56 = vsel %vm598_vm10, -3.5233877e-06, %v1724_v44 }
 0x15b   : > { %v673_v34 = vadd.f32 %v669_v27, %v665_v29  ;;  %v670_v37 = vmul.f32 %v662_v32, %v1983_v31  ;;  %v640_v38 = vsel %vm638_vm12, %v639_v30, %v637_v33  ;;  %v1299_v57 = vadd.f32 -2.5, %v1950_v51 }
 0x15c   : > { %v1302_v48 = vadd.f32 -3.0, %v640_v38  ;;  %vm600_vm0 = vcmp.lt.f32.partialorder %v1950_v51, 5.0  ;;  %v690_v10 = vsel %vm598_vm10, -4.3915065e-06, %v1725_v62  ;;  %v679_v18 = vsel %vm599_vm15, -3.5233877e-06, %v1724_v44 }
 0x15d   : > { %v681_v40 = vmul.f32 %v673_v34, %v1969_v19  ;;  %v674_v45 = vadd.f32 %v670_v37, %v666_v39  ;;  %v664_v5 = vsel %vm600_vm0, 2.8102264e-08, %v1722_v20  ;;  %v668_v11 = vsel %vm600_vm0, 3.4327394e-07, %v1723_v28 }
 0x15e   : > { %v2004_v53 = vsel %vm599_vm15, %v1298_v41, %v1302_v48  ;;  %v1727_v30 = vmov -0.0076224613   ;;  %v691_v33 = vsel %vm599_vm15, -4.3915065e-06, %v1725_v62  ;;  %v1728_v48 = vmov 0.0094388705  }
 0x15f   : > { %v1575_v60 = vpop.eup %1574  ;;  %v685_v50 = vadd.f32 %v681_v40, %v677_v46  ;;  %v682_v55 = vmul.f32 %v674_v45, %v1983_v31  ;;  %v671_v61 = vmul.f32 %v663_v54, %v2004_v53  ;;  %v713_v32 = vsel %vm597_vm9, -0.001253725, %v1727_v30 }
 0x160   : > { %v642_v1 = vmul.f32 %v1575_v60, %v1950_v51  ;;  %v714_v41 = vsel %vm598_vm10, -0.001253725, %v1727_v30 }
 0x161   : > { %v686_v2 = vadd.f32 %v682_v55, %v678_v56 }
 0x162   : > { %v643_v7 = vmul.f32 %v1575_v60, %v642_v1  ;;  %v667_v1 = vsel %vm599_vm15, 3.4327394e-07, %v1723_v28  ;;  %v680_v28 = vsel %vm600_vm0, -3.5233877e-06, %v1724_v44 }
 0x163   : > { %v694_v8 = vmul.f32 %v686_v2, %v1983_v31  ;;  %v715_v2 = vsel %vm599_vm15, -0.001253725, %v1727_v30 }
 0x164   : > { %v644_v16 = vmul.f32 0.5, %v643_v7  ;;  %v675_v7 = vadd.f32 %v671_v61, %v667_v1 }
 0x165   : > { %v698_v20 = vadd.f32 %v694_v8, %v690_v10 }
 0x166   : > { %v645_v22 = vsub.f32 1.5, %v644_v16  ;;  %v683_v14 = vmul.f32 %v675_v7, %v2004_v53  ;;  %v1726_v16 = vmov 0.0057395077   ;;  %v831_v7 = vld [vmem:[%s2208_s9] sm:$0x3] }
 0x167   : > { %v701_v17 = vsel %vm597_vm9, 0.00021858087, %v1726_v16  ;;  %v706_v24 = vmul.f32 %v698_v20, %v1983_v31  ;;  %v702_v27 = vsel %vm598_vm10, 0.00021858087, %v1726_v16  ;;  %v703_v45 = vsel %vm599_vm15, 0.00021858087, %v1726_v16 }
 0x168   : > { %v646_v0 = vmul.f32 %v1575_v60, %v645_v22  ;;  %v693_v60 = vmul.f32 %v685_v50, %v1969_v19  ;;  %v687_v23 = vadd.f32 %v683_v14, %v679_v18  ;;  %v2076_v10 = vperm.slane %v831_v7, 1 }
 0x169   : > { %v710_v34 = vadd.f32 %v706_v24, %v702_v27 }
 0x16a   : > { %v647_v36 = vmul.f32 %v646_v0, %v1950_v51  ;;  %v697_v6 = vadd.f32 %v693_v60, %v689_v63  ;;  %v695_v0 = vmul.f32 %v687_v23, %v2004_v53  ;;  %v704_v60 = vsel %vm600_vm0, 0.00021858087, %v1726_v16 }
 0x16b   : > { %v718_v39 = vmul.f32 %v710_v34, %v1983_v31  ;;  %v1729_v63 = vmov 1.001674   ;;  %v716_v16 = vsel %vm600_vm0, -0.001253725, %v1727_v30  ;;  %v727_v23 = vsel %vm599_vm15, -0.0041776816, %v1728_v48 }
 0x16c   : > { %v649_v49 = vsel %vm648_vm13, %v1950_v51, %v647_v36  ;;  %v705_v12 = vmul.f32 %v697_v6, %v1969_v19  ;;  %v699_v38 = vadd.f32 %v695_v0, %v691_v33  ;;  %v737_v1 = vsel %vm597_vm9, 0.24664073, %v1729_v63 }
 0x16d   : > { %v652_v52 = vsel %vm650_vm14, %v651_v42, %v649_v49  ;;  %v692_v42 = vsel %vm600_vm0, -4.3915065e-06, %v1725_v62  ;;  %v725_v49 = vsel %vm597_vm9, -0.0041776816, %v1728_v48  ;;  %v722_v50 = vadd.f32 %v718_v39, %v714_v41 }
 0x16e   : > { %v1303_v58 = vadd.f32 -3.0, %v652_v52  ;;  %v709_v22 = vadd.f32 %v705_v12, %v701_v17  ;;  %v707_v46 = vmul.f32 %v699_v38, %v2004_v53  ;;  %v738_v14 = vsel %vm598_vm10, 0.24664073, %v1729_v63 }
 0x16f   : > { %v730_v56 = vmul.f32 %v722_v50, %v1983_v31  ;;  %v761_v30 = vand.u32 2147483647, %v1920_v35 }
 0x170   : > { %v2021_v3 = vsel %vm600_vm0, %v1299_v57, %v1303_v58  ;;  %v717_v29 = vmul.f32 %v709_v22, %v1969_v19  ;;  %v711_v55 = vadd.f32 %v707_v46, %v703_v45  ;;  %v726_v58 = vsel %vm598_vm10, -0.0041776816, %v1728_v48 }
 0x171   : > { %v672_v9 = vmul.f32 %v664_v5, %v2021_v3  ;;  %v734_v5 = vadd.f32 %v730_v56, %v726_v58  ;;  %vm765_vm1 = vcmp.eq.f32.partialorder %v761_v30, 1.0  ;;  %v2108_v56 = vperm.slane %v831_v7, 0 }
 0x172   : > { %v721_v37 = vadd.f32 %v717_v29, %v713_v32  ;;  %v719_v62 = vmul.f32 %v711_v55, %v2004_v53  ;;  %v740_v58 = vsel %vm600_vm0, 0.24664073, %v1729_v63 }
 0x173   : > { %v676_v21 = vadd.f32 %v672_v9, %v668_v11  ;;  %v742_v11 = vmul.f32 %v734_v5, %v1983_v31 }
 0x174   : > { %v729_v44 = vmul.f32 %v721_v37, %v1969_v19  ;;  %v723_v9 = vadd.f32 %v719_v62, %v715_v2  ;;  %v769_v37 = vmul.f32 inf, %v1920_v35  ;;  %v2120_v2 = vand.u32 127, %v395_v13 }
 0x175   : > { %v684_v25 = vmul.f32 %v676_v21, %v2021_v3  ;;  %v1730_v21 = vmov 2.8329768  }
 0x176   : > { %v733_v54 = vadd.f32 %v729_v44, %v725_v49  ;;  %v731_v18 = vmul.f32 %v723_v9, %v2004_v53  ;;  %v749_v22 = vsel %vm597_vm9, 1.5014094, %v1730_v21  ;;  %v750_v26 = vsel %vm598_vm10, 1.5014094, %v1730_v21 }
 0x177   : > { %v688_v36 = vadd.f32 %v684_v25, %v680_v28  ;;  %v746_v25 = vadd.f32 %v742_v11, %v738_v14  ;;  %v762_v44 = vand.u32 2147483647, %v1926_v43  ;;  %vm1150_vm3 = vcmp.lt.s32.totalorder %v2120_v2, 96 }
 0x178   : > { %v741_v61 = vmul.f32 %v733_v54, %v1969_v19  ;;  %v735_v0 = vadd.f32 %v731_v18, %v727_v23  ;;  %v752_v18 = vsel %vm600_vm0, 1.5014094, %v1730_v21  ;;  %vm1149_vm4 = vcmp.lt.s32.totalorder %v2120_v2, 64 }
 0x179   : > { %v696_v40 = vmul.f32 %v688_v36, %v2021_v3  ;;  %v754_v32 = vmul.f32 %v746_v25, %v1983_v31  ;;  %v728_v36 = vsel %vm600_vm0, -0.0041776816, %v1728_v48  ;;  %v739_v31 = vsel %vm599_vm15, 0.24664073, %v1729_v63 }
 0x17a   : > { %v745_v8 = vadd.f32 %v741_v61, %v737_v1  ;;  %v743_v39 = vmul.f32 %v735_v0, %v2004_v53  ;;  %vm2110_vm2 = vcmp.eq.f32.partialorder %v762_v44, 1.0 }
 0x17b   : > { %v700_v52 = vadd.f32 %v696_v40, %v692_v42  ;;  %v758_v42 = vadd.f32 %v754_v32, %v750_v26 }
 0x17c   : > { %v753_v17 = vmul.f32 %v745_v8, %v1969_v19  ;;  %v747_v49 = vadd.f32 %v743_v39, %v739_v31 }
 0x17d   : > { %v708_v57 = vmul.f32 %v700_v52, %v2021_v3  ;;  %v774_v52 = vmul.f32 %v758_v42, %v1926_v43 }
 0x17e   : > { %v757_v29 = vadd.f32 %v753_v17, %v749_v22  ;;  %v755_v61 = vmul.f32 %v747_v49, %v2004_v53 }
 0x17f   : > { %v712_v6 = vadd.f32 %v708_v57, %v704_v60 }
 0x180   : > { %v773_v38 = vmul.f32 %v757_v29, %v1920_v35  ;;  %v770_v35 = vmul.f32 inf, %v1926_v43  ;;  %v751_v43 = vsel %vm599_vm15, 1.5014094, %v1730_v21 }
 0x181   : > { %v720_v12 = vmul.f32 %v712_v6, %v2021_v3  ;;  %v759_v9 = vadd.f32 %v755_v61, %v751_v43 }
 0x182   : > { %v777_v46 = vsel %vm765_vm1, %v769_v37, %v773_v38  ;;  %v778_v5 = vsel %vm2110_vm2, %v770_v35, %v774_v52 }
 0x183   : > { %v724_v27 = vadd.f32 %v720_v12, %v716_v16  ;;  %v781_v55 = vmul.f32 1.4142135, %v777_v46  ;;  %v782_v11 = vmul.f32 1.4142135, %v778_v5  ;;  %v763_v12 = vand.u32 2147483647, %v1931_v59 }
 0x184   : > { %v775_v22 = vmul.f32 %v759_v9, %v1931_v59 }
 0x185   : > { %v732_v33 = vmul.f32 %v724_v27, %v2021_v3  ;;  %vm2140_vm5 = vcmp.eq.f32.partialorder %v763_v12, 1.0 }
 0x187   : > { %v736_v15 = vadd.f32 %v732_v33, %v728_v36 }
 0x189   : > { %v744_v54 = vmul.f32 %v736_v15, %v2021_v3 }
 0x18b   : > { %v748_v7 = vadd.f32 %v744_v54, %v740_v58 }
 0x18d   : > { %v756_v14 = vmul.f32 %v748_v7, %v2021_v3 }
 0x18f   : > { %v760_v27 = vadd.f32 %v756_v14, %v752_v18 }
 0x191   : > { %v776_v26 = vmul.f32 %v760_v27, %v1934_v4 }
 0x1c5   : > { %v1117_v20 = vpop.f32.mrf.mxu0 }
 0x1c6   : > { %v1118_v24 = vadd.f32 %v1117_v20, %v2076_v10  ;;  %v771_v20 = vmul.f32 inf, %v1931_v59 }
 0x1c8   : > { %v1127_v28 = vmul.f32 0.5, %v1118_v24  ;;  %v779_v30 = vsel %vm2140_vm5, %v771_v20, %v775_v22 }
 0x1c9   : > { %v783_v36 = vmul.f32 1.4142135, %v779_v30 }
 0x1ca   : > { %v1131_v19 = vmul.f32 1.442695, %v1127_v28  ;;  %v764_v28 = vand.u32 2147483647, %v1934_v4 }
 0x1cb   : > { %v1098_v34 = vpop.f32.mrf.mxu3 }
 0x1cc   : > { %1576 = vpow2.f32 %v1131_v19  ;;  %v1099_v63 = vadd.f32 %v1098_v34, %v2108_v56  ;;  %v772_v34 = vmul.f32 inf, %v1934_v4  ;;  %vm768_vm6 = vcmp.eq.f32.partialorder %v764_v28, 1.0 }
 0x1cd   : > { %v1119_v40 = vpop.f32.mrf.mxu0 }
 0x1ce   : > { %v1120_v41 = vadd.f32 %v1119_v40, %v2076_v10  ;;  %v780_v38 = vsel %vm768_vm6, %v772_v34, %v776_v26 }
 0x1d0   : > { %v1128_v48 = vmul.f32 0.5, %v1120_v41  ;;  %v784_v41 = vmul.f32 1.4142135, %v780_v38 }
 0x1d2   : > { %v1577_v45 = vpop.eup %1576  ;;  %v1133_v50 = vmul.f32 1.442695, %v1128_v48 }
 0x1d3   : > { %v1100_v60 = vpop.f32.mrf.mxu3  ;;  %v1139_v62 = vmul.f32 %v1577_v45, %v781_v55 }
 0x1d4   : > { %1578 = vpow2.f32 %v1133_v50  ;;  %v1101_v16 = vadd.f32 %v1100_v60, %v2108_v56 }
 0x1d5   : > { %v1122_v1 = vpop.f32.mrf.mxu1  ;;  %v1143_v53 = vadd.f32 %v1139_v62, %v1099_v63 }
 0x1d6   : > { %v1123_v6 = vadd.f32 %v1122_v1, %v2076_v10 }
 0x1d7   : > { %v1151_v23 = vsel %vm1150_vm3, %v1143_v53, 0.0 }
 0x1d8   : > { %v1129_v8 = vmul.f32 0.5, %v1123_v6  ;;  %v1155_v29 = vsel %vm1149_vm4, %v1099_v63, %v1151_v23 }
 0x1da   : > { %v1579_v47 = vpop.eup %1578  ;;  %v1135_v13 = vmul.f32 1.442695, %v1129_v8 }
 0x1db   : > { %v1140_v17 = vmul.f32 %v1579_v47, %v782_v11  ;;  %v1103_v51 = vpop.f32.mrf.mxu3 }
 0x1dc   : > { %1580 = vpow2.f32 %v1135_v13  ;;  %v1104_v39 = vadd.f32 %v1103_v51, %v2108_v56 }
 0x1dd   : > { %v1144_v24 = vadd.f32 %v1140_v17, %v1101_v16  ;;  %v1124_v25 = vpop.f32.mrf.mxu1 }
 0x1de   : > { %v1125_v21 = vadd.f32 %v1124_v25, %v2076_v10 }
 0x1df   : > { %v1152_v59 = vsel %vm1150_vm3, %v1144_v24, 0.0 }
 0x1e0   : > { %v1156_v0 = vsel %vm1149_vm4, %v1101_v16, %v1152_v59  ;;  %v1130_v19 = vmul.f32 0.5, %v1125_v21 }
 0x1e1   : > { %v1467_v32 = vpack.c.bf16 %v1156_v0, %v1155_v29 }
 0x1e2   : > { %v1581_v33 = vpop.eup %1580  ;;  %v1137_v10 = vmul.f32 1.442695, %v1130_v19 }
 0x1e3   : > { %1468 = vst [vmem:[%s378_s28] sm:$0xff] %v1467_v32   ;;  %v1141_v37 = vmul.f32 %v1581_v33, %v783_v36  ;;  %v1105_v40 = vpop.f32.mrf.mxu3 }
 0x1e4   : > { %1582 = vpow2.f32 %v1137_v10  ;;  %v1106_v4 = vadd.f32 %v1105_v40, %v2108_v56 }
 0x1e5   : > { %v1145_v31 = vadd.f32 %v1141_v37, %v1104_v39 }
 0x1e7   : > { %v1153_v44 = vsel %vm1150_vm3, %v1145_v31, 0.0 }
 0x1e8   : > { %v1157_v49 = vsel %vm1149_vm4, %v1104_v39, %v1153_v44 }
 0x1ea   : > { %v1583_v42 = vpop.eup %1582 }
 0x1eb   : > { %v1142_v15 = vmul.f32 %v1583_v42, %v784_v41 }
 0x1ed   : > { %v1146_v46 = vadd.f32 %v1142_v15, %v1106_v4 }
 0x1ef   : > { %v1154_v48 = vsel %vm1150_vm3, %v1146_v46, 0.0 }
 0x1f0   : > { %v1158_v45 = vsel %vm1149_vm4, %v1106_v4, %v1154_v48 }
 0x1f1   : > { %v1472_v50 = vpack.c.bf16 %v1158_v45, %v1157_v49 }
 0x1f3   : > { %1474 = vst [vmem:[%s378_s28 + $0x8] sm:$0xff] %v1472_v50  }
 0x1f4   : > { %1671 = shalt.err (!%p1668_p8)
}
 0x1f5   : > { %s1731_s22 = smov 64   ;;  %s1732_s28 = smov 4  }
 0x1f6   : > { %1491 = dma.vmem_to_hbm [thread:$0]  (%p1829_p5), %s1181_s30, 256, %s1183_s26, %s1168_s0, %s1731_s22, %s1731_s22, %s1732_s28  }
 0x1f7 PF: > { %p1508_p9 = scmp.ge.s32.totalorder %s1714_s18, 2  ;;  %s1197_s11 = sand.u32 1, %s1702_s15  }
 0x1f8   : > { %s1198_s14 = scalar_lea.sflag [#allocation6], %s1197_s11 }
 0x1f9   : > { %p1501_p10 = pnand %p1508_p9, %p1833_p6 }
 0x1fb   : > { %p1502_p11 = pneg %p1501_p10 }
 0x1fd   : > { %1697 = dma.done.wait (%p1502_p11), %s1198_s14, 256  }
 0x1fe   : > { %1699 = vsyncadd (%p1502_p11), %s1198_s14, 4294967040  ;;  %p23_p12 = scmp.ge.s32.totalorder %s1816_s20, 4   ;;  %s2219_s15 = smov %s1706_s16 }
 0x1ff   : > { %s2220_s16 = smov %s1710_s17  ;;  %s2221_s17 = smov %s1827_s23 }
 0x200   : > { %s2222_s18 = smov %s1816_s20  ;;  %25 = sbr.rel (!%p23_p12) target bundleno = 8 (0x8), region = 103 }
 0x205   :  { %1204 = vsyncpa [#allocation5], 1 }
 0x206   :  { %1206 = vsyncpa [#allocation5 + $0x1], 1 }
 0x207   :  { %1207 = vsyncpa [#allocation8], 1 }
 0x208   :  { %1208 = vsyncpa [#allocation6], 1 }
 0x209   :  { %1210 = vsyncpa [#allocation6 + $0x1], 1 }

// kernel: tpu_custom_call.1
= control target key start
LH: loop header
LB: loop body
LE: loop exit
PB: predicated region body
PF: predicated region fallthrough
CT: control target
= control target key end

     0   :  { %s1652_s0 = inlined_call_operand.<no memory space> [shape: s32[1], index: 0, kind: input, shape index: {}]   ;;  %s1653_s1 = inlined_call_operand.vmem [shape: bf16[64,16], index: 1, kind: input, shape index: {}]   ;;  %s1654_s2 = inlined_call_operand.vmem [shape: bf16[64,16], index: 2, kind: input, shape index: {}]   ;;  %s1655_s3 = inlined_call_operand.vmem [shape: f32[64,128], index: 3, kind: input, shape index: {}]   ;;  %s1656_s4 = inlined_call_operand.vmem [shape: bf16[16,128], index: 4, kind: input, shape index: {}]   ;;  %s1657_s5 = inlined_call_operand.hbm [shape: bf16[16,128], index: 5, kind: input, shape index: {}]   ;;  %s1658_s6 = inlined_call_operand.vmem [shape: f32[1,128], index: 6, kind: input, shape index: {}]   ;;  %s1659_s7 = inlined_call_operand.hbm [shape: bf16[128,128], index: 7, kind: input, shape index: {}]   ;;  %s1660_s8 = inlined_call_operand.vmem [shape: f32[1,128], index: 8, kind: input, shape index: {}]   ;;  %s1661_s9 = inlined_call_operand.hbm [shape: bf16[128,256], index: 9, kind: input, shape index: {}]   ;;  %s1662_s10 = inlined_call_operand.vmem [shape: f32[1,256], index: 10, kind: input, shape index: {}]   ;;  %s1663_s11 = inlined_call_operand.hbm [shape: bf16[64,128], index: 11, kind: output, shape index: {}]  }
   0x1   :  { %1667 = sst [smem:[#allocation17_spill]] %s1657_s5 }
   0x2   :  { %1668 = sst [smem:[#allocation18_spill]] %s1659_s7 }
   0x3   :  { %17 = vsyncpa [#allocation5], 0 }
   0x4   :  { %18 = vsyncpa [#allocation8], 0 }
   0x5   :  { %19 = vsyncpa [#allocation6], 0 }
   0x6   :  { %21 = vsyncpa [#allocation6 + $0x1], 0  ;;  %s1490_s16 = smov 0   ;;  %s1492_s17 = smov 0  }
   0x7   :  { %s1494_s18 = smov 0   ;;  %s1496_s19 = smov 0  }
   0x8 LB: > { %1669 = sst [smem:[#allocation14_spill]] %s1415_s18  ;;  %s1511_s20 = sadd.s32 4294967295, %s1419_s19   ;;  %s1419_s19 = sphi %s1496_s19, %s1678_s19   ;;  %s1415_s18 = sphi %s1494_s18, %s1680_s18   ;;  %s1411_s17 = sphi %s1492_s17, %s1682_s17   ;;  %s1407_s16 = sphi %s1490_s16, %s1681_s16  }
   0x9   : > { %s977_s21 = sadd.s32 4294967294, %s1419_s19   ;;  %s1515_s22 = sadd.s32 1, %s1419_s19  }
   0xa   : > { %1670 = sst [smem:[#allocation15_spill]] %s1515_s22  ;;  %s259_s23 = sadd.s32 1, %s1415_s18 }
   0xb   : > { %s256_s24 = ssub.s32 %s1419_s19, %s1515_s22  ;;  %p269_p0 = scmp.ne.s32.totalorder %s1415_s18, %s1411_s17 }
   0xc   : > { %p257_p1 = scmp.eq.s32.totalorder %s256_s24, 0  ;;  %p270_p2 = scmp.eq.s32.totalorder %s1511_s20, 1 }
   0xd   : > { %p275_p3 = scmp.ne.s32.totalorder %s1411_s17, %s1407_s16  ;;  %p276_p4 = scmp.eq.s32.totalorder %s977_s21, 1 }
   0xe   : > { %s1526_s25 = scalar_select %p257_p1, %s1415_s18, %s259_s23  }
   0xf   : > { %p1528_p5 = por %p270_p2, %p269_p0  ;;  %p1532_p6 = por %p276_p4, %p275_p3 }
  0x10   : > { %1671 = sst [smem:[#allocation16_spill]] %s1526_s25  ;;  %p978_p7 = scmp.ge.s32.totalorder %s1419_s19, 1 }
  0x11   : > { %p283_p8 = scmp.lt.s32.totalorder %s1419_s19, 3  ;;  %p1201_p9 = scmp.eq.s32.totalorder %s1511_s20, 0 }
  0x12   : > { %s1675_s7 = sld [smem:[#allocation18_spill]]  ;;  %s1421_s21 = smov [#allocation7]  }
  0x13   : > { %p1539_p10 = pnand %p978_p7, %p283_p8  ;;  %s1676_s5 = sld [smem:[#allocation17_spill]] }
  0x14   : > { %s316_s23 = sshll.u32 %s1421_s21, 4  ;;  %s1422_s24 = smov 64   ;;  %s317_s23 = int_to_ptr.vmem [resolvable:$true] %s316_s23 }
  0x15   : > { %p1187_p11 = pneg %p1539_p10  ;;  %s1423_s28 = smov 4  }
  0x16   : > { %s1424_s29 = smov [#allocation4]   ;;  %s1425_s25 = smov [#allocation9]  }
  0x17   : > { %p1553_p12 = pnand %p1201_p9, %p1187_p11  ;;  %s333_s18 = sshll.u32 %s1425_s25, 4  ;;  %s334_s18 = int_to_ptr.vmem [resolvable:$true] %s333_s18 }
  0x18   : > { %s314_s30 = sshll.u32 %s1675_s7, 4  ;;  %s299_s7 = sshll.u32 %s1424_s29, 4  ;;  %s315_s30 = int_to_ptr.hbm [resolvable:$true] %s314_s30  ;;  %s300_s7 = int_to_ptr.vmem [resolvable:$true] %s299_s7 }
  0x19   : > { %s297_s14 = sshll.u32 %s1676_s5, 4  ;;  %s331_s5 = sshll.u32 %s1661_s9, 4  ;;  %s298_s14 = int_to_ptr.hbm [resolvable:$true] %s297_s14  ;;  %s332_s5 = int_to_ptr.hbm [resolvable:$true] %s331_s5 }
  0x1a   : > { %1193 = dma.hbm_to_vmem [thread:$0]  (!%p1553_p12), %s315_s30, 1024, %s317_s23, [#allocation8], %s1422_s24, %s1422_s24, %s1423_s28  }
  0x1b   : > { %1190 = dma.hbm_to_vmem [thread:$0]  (!%p1553_p12), %s298_s14, 128, %s300_s7, [#allocation5], %s1422_s24, %s1422_s24, %s1423_s28  }
  0x1c   : > { %s1426_s21 = smov 128   ;;  %s1427_s22 = smov 8  }
  0x1d   : > { %1196 = dma.hbm_to_vmem [thread:$0]  (!%p1553_p12), %s332_s5, 2048, %s334_s18, [#allocation8], %s1426_s21, %s1426_s21, %s1427_s22  }
  0x1e   : > { %379 = sbr.rel (%p1539_p10) target bundleno = 509 (0x1fd), region = 60 }
  0x23   : > { %1394 = dma.done.wait (%p1201_p9), [#allocation5], 128  }
  0x24   : > { %1396 = vsyncadd (%p1201_p9), [#allocation5], 4294967168 }
  0x25   : > { %1398 = dma.done.wait (%p1201_p9), [#allocation8], 3072  }
  0x26   : > { %1400 = vsyncadd (%p1201_p9), [#allocation8], 4294964224  ;;  %s988_s7 = sshll.u32 %s1511_s20, 2  ;;  %v1128_v0 = vld [vmem:[#allocation4] sm:$0xff]  ;;  %vm525_vm0 = vcmask 130048   ;;  %v1135_v5 = vld [vmem:[#allocation7 + $0x30] sm:$0xff] }
  0x27   : > { %p439_p13 = scmp.lt.s32.totalorder %s988_s7, 7  ;;  %v1127_v1 = vld [vmem:[%s1656_s4] sm:$0xff]  ;;  %539 = vmatpush.bf16.msra.mxu0 %v1128_v0  ;;  %v1134_v6 = vld [vmem:[#allocation7 + $0x28] sm:$0xff]  ;;  %v1133_v7 = vld [vmem:[#allocation7 + $0x20] sm:$0xff]  ;;  %s1369_s18 = scalar_lea.hbm %s1663_s11, 32 }
  0x28   : > { %580 = vmatpush.bf16.msra.mxu1 %v1127_v1  ;;  %v1136_v4 = vld [vmem:[#allocation7 + $0x38] sm:$0xff]  ;;  %v1131_v11 = vld [vmem:[#allocation7 + $0x10] sm:$0xff]  ;;  %v1130_v12 = vld [vmem:[#allocation7 + $0x8] sm:$0xff] }
  0x29   : > { %s1684_s7 = smov (!%p439_p13, %s988_s7), 7  ;;  %656 = vmatpush.bf16.msra.mxu2 %v1136_v4  ;;  %v1132_v10 = vld [vmem:[#allocation7 + $0x18] sm:$0xff]  ;;  %v1129_v13 = vld [vmem:[#allocation7] sm:$0xff]  ;;  %v1112_v16 = vld [vmem:[#allocation9 + $0x70] sm:$0xf] }
  0x2a   : > { %s989_s5 = sshll.u32 %s1684_s7, 2  ;;  %v1152_v17 = vld [vmem:[#allocation9 + $0x74] sm:$0xf0]  ;;  %v1151_v18 = vld [vmem:[#allocation9 + $0x74] sm:$0xf] }
  0x2b   : > { %s448_s25 = scalar_lea.vmem %s1654_s2, %s989_s5  ;;  %s442_s14 = scalar_lea.vmem %s1653_s1, %s989_s5  ;;  %v1113_v19 = vor.u32 %v1152_v17, %v1112_v16  ;;  %v1114_v20 = vld [vmem:[#allocation9 + $0x78] sm:$0xf0]  ;;  %v1104_v21 = vld [vmem:[#allocation9 + $0x60] sm:$0xf]  ;;  %v1150_v22 = vld [vmem:[#allocation9 + $0x64] sm:$0xf0] }
  0x2c   : > { %v1125_v2 = vld [vmem:[%s448_s25] sm:$0xff]  ;;  %v1126_v8 = vld [vmem:[%s448_s25 + $0x8] sm:$0xff]  ;;  %v1117_v23 = vor.u32 %v1151_v18, %v1114_v20  ;;  %v1106_v25 = vld [vmem:[#allocation9 + $0x68] sm:$0xf0]  ;;  %v1105_v26 = vor.u32 %v1150_v22, %v1104_v21  ;;  %s993_s5 = sshll.u32 %s1684_s7, 3  ;;  %s435_s7 = sand.u32 1, %s1411_s17  }
  0x2d   : > { %v1123_v3 = vld [vmem:[%s442_s14] sm:$0xff]  ;;  %1006 = vmatmul.msk.bf16.vlgmr.msra.gmra.mxu0 %vm525_vm0, %v1125_v2  ;;  %657 = vmatpush.bf16.msra.mxu2 %v1135_v5  ;;  %v1124_v9 = vld [vmem:[%s442_s14 + $0x8] sm:$0xff]  ;;  %v1096_v30 = vld [vmem:[#allocation9 + $0x50] sm:$0xf]  ;;  %s1602_s25 = scalar_lea.vmem %s1655_s3, %s993_s5  ;;  %s987_s27 = sshll.u32 %s435_s7, 4 }
  0x2e   : > { %1020 = vmatmul.msk.bf16.vlgmr.msra.gmra.mxu1 %vm525_vm0, %v1123_v3  ;;  %v1149_v24 = vld [vmem:[#allocation9 + $0x64] sm:$0xf]  ;;  %766 = vmatpush.bf16.msra.mxu3 %v1113_v19  ;;  %v1249_v28 = vld [vmem:[%s1658_s6] ss:$0 sm:$0xff]  ;;  %v1147_v32 = vld [vmem:[#allocation9 + $0x54] sm:$0xf] }
  0x2f   : > { %785 = vmatpush.bf16.msrb.mxu0 %v1117_v23  ;;  %v1109_v29 = vor.u32 %v1149_v24, %v1106_v25  ;;  %v1148_v31 = vld [vmem:[#allocation9 + $0x54] sm:$0xf0]  ;;  %1165 = vmatpush.bf16.msrb.mxu1 %v1117_v23  ;;  %v1098_v33 = vld [vmem:[#allocation9 + $0x58] sm:$0xf0]  ;;  %v1088_v40 = vld [vmem:[#allocation9 + $0x40] sm:$0xf] }
  0x30   : > { %v1097_v36 = vor.u32 %v1148_v31, %v1096_v30  ;;  %v1101_v39 = vor.u32 %v1147_v32, %v1098_v33  ;;  %v1146_v41 = vld [vmem:[#allocation9 + $0x44] sm:$0xf0]  ;;  %v1145_v42 = vld [vmem:[#allocation9 + $0x44] sm:$0xf]  ;;  %v1090_v43 = vld [vmem:[#allocation9 + $0x48] sm:$0xf0] }
  0x31   : > { %658 = vmatpush.bf16.msra.mxu2 %v1134_v6  ;;  %v1089_v45 = vor.u32 %v1146_v41, %v1088_v40  ;;  %v1093_v48 = vor.u32 %v1145_v42, %v1090_v43  ;;  %v1080_v61 = vld [vmem:[#allocation9 + $0x30] sm:$0xf]  ;;  %v1144_v62 = vld [vmem:[#allocation9 + $0x34] sm:$0xf0]  ;;  %v1143_v63 = vld [vmem:[#allocation9 + $0x34] sm:$0xf] }
  0x32   : > { %767 = vmatpush.bf16.msra.mxu3 %v1105_v26  ;;  %v1081_v0 = vor.u32 %v1144_v62, %v1080_v61  ;;  %v1082_v1 = vld [vmem:[#allocation9 + $0x38] sm:$0xf0]  ;;  %v1072_v3 = vld [vmem:[#allocation9 + $0x20] sm:$0xf]  ;;  %v1142_v4 = vld [vmem:[#allocation9 + $0x24] sm:$0xf0] }
  0x33   : > { %786 = vmatpush.bf16.msrb.mxu0 %v1109_v29  ;;  %1166 = vmatpush.bf16.msrb.mxu1 %v1109_v29  ;;  %v1085_v2 = vor.u32 %v1143_v63, %v1082_v1  ;;  %v1141_v5 = vld [vmem:[#allocation9 + $0x24] sm:$0xf]  ;;  %v1073_v6 = vor.u32 %v1142_v4, %v1072_v3  ;;  %v1138_v16 = vld [vmem:[#allocation9 + $0x4] sm:$0xf0]  ;;  %v1058_v19 = vld [vmem:[#allocation9 + $0x8] sm:$0xf0] }
  0x34   : > { %v1137_v17 = vld [vmem:[#allocation9 + $0x4] sm:$0xf]  ;;  %v1250_v22 = vld [vmem:[%s1660_s8] ss:$0 sm:$0xff]  ;;  %s437_s30 = scalar_lea.vmem [#allocation10], %s987_s27  ;;  %s1153_s14 = sshll.u32 %s1511_s20, 4 }
  0x35   : > { %659 = vmatpush.bf16.msra.mxu2 %v1133_v7  ;;  %v1074_v7 = vld [vmem:[#allocation9 + $0x28] sm:$0xf0]  ;;  %v1061_v20 = vor.u32 %v1137_v17, %v1058_v19  ;;  %s856_s24 = scalar_lea.hbm %s1663_s11, %s1153_s14  ;;  %s857_s28 = sshll.u32 %s437_s30, 4  ;;  %s858_s28 = int_to_ptr.vmem [resolvable:$true] %s857_s28 }
  0x36   : > { %768 = vmatpush.bf16.msra.mxu3 %v1097_v36  ;;  %v508_v36 = vld [vmem:[%s1662_s10] sm:$0x3]  ;;  %s859_s29 = sshll.u32 %s856_s24, 4  ;;  %s845_s20 = scalar_lea.sflag [#allocation6], %s435_s7  ;;  %s860_s29 = int_to_ptr.hbm [resolvable:$true] %s859_s29 }
  0x37   : > { %787 = vmatpush.bf16.msrb.mxu0 %v1101_v39  ;;  %1167 = vmatpush.bf16.msrb.mxu1 %v1101_v39  ;;  %s1363_s12 = sshra.s32 %s860_s29, 4  ;;  %s1364_s12 = int_to_ptr.hbm [resolvable:$true] %s1363_s12 }
  0x38   : > { %s1365_s13 = scalar_lea.hbm %s1364_s12, 16  ;;  %p1370_p3 = scmp.lt.s32.totalorder %s1364_s12, %s1663_s11 }
  0x39   : > { %660 = vmatpush.bf16.msra.mxu2 %v1132_v10  ;;  %v1140_v10 = vld [vmem:[#allocation9 + $0x14] sm:$0xf0]  ;;  %p1366_p0 = scmp.ne.s32.totalorder %s1364_s12, %s1365_s13  ;;  %p1371_p4 = scmp.lt.s32.totalorder %s1369_s18, %s1365_s13 }
  0x3a   : > { %769 = vmatpush.bf16.msra.mxu3 %v1089_v45 }
  0x3b   : > { %788 = vmatpush.bf16.msrb.mxu0 %v1093_v48  ;;  %1168 = vmatpush.bf16.msrb.mxu1 %v1093_v48  ;;  %v824_v48 = vlaneseq  ;;  %p1367_p1 = pnand %p1366_p0, %p1528_p5  ;;  %p1372_p7 = por %p1371_p4, %p1370_p3 }
  0x3d   : > { %1007 = vmatmul.msk.bf16.gmra.mxu0 %vm525_vm0, %v1126_v8  ;;  %661 = vmatpush.bf16.msra.mxu2 %v1131_v11  ;;  %v1077_v8 = vor.u32 %v1141_v5, %v1074_v7  ;;  %v1139_v11 = vld [vmem:[#allocation9 + $0x14] sm:$0xf]  ;;  %p1368_p2 = pneg %p1367_p1 }
  0x3e   : > { %1021 = vmatmul.msk.bf16.gmra.mxu1 %vm525_vm0, %v1124_v9  ;;  %770 = vmatpush.bf16.msra.mxu3 %v1081_v0  ;;  %v1064_v9 = vld [vmem:[#allocation9 + $0x10] sm:$0xf] }
  0x3f   : > { %789 = vmatpush.bf16.msrb.mxu0 %v1085_v2  ;;  %1169 = vmatpush.bf16.msrb.mxu1 %v1085_v2  ;;  %p1373_p8 = pnand %p1372_p7, %p1368_p2 }
  0x41   : > { %662 = vmatpush.bf16.msra.mxu2 %v1130_v12  ;;  %v1065_v12 = vor.u32 %v1140_v10, %v1064_v9 }
  0x42   : > { %771 = vmatpush.bf16.msra.mxu3 %v1073_v6 }
  0x43   : > { %790 = vmatpush.bf16.msrb.mxu0 %v1077_v8  ;;  %1170 = vmatpush.bf16.msrb.mxu1 %v1077_v8 }
  0x45   : > { %663 = vmatpush.bf16.msra.mxu2 %v1129_v13  ;;  %v1066_v13 = vld [vmem:[#allocation9 + $0x18] sm:$0xf0] }
  0x46   : > { %772 = vmatpush.bf16.msra.mxu3 %v1065_v12 }
  0xaa   : > { %v541_v14 = vpop.f32.mrf.mxu0 }
  0xab   : > { %v582_v15 = vpop.f32.mrf.mxu1 }
  0xac   : > { %v583_v27 = vadd.f32 %v582_v15, %v541_v14  ;;  %v1069_v14 = vor.u32 %v1139_v11, %v1066_v13  ;;  %v1056_v15 = vld [vmem:[#allocation9] sm:$0xf]  ;;  %v468_v11 = vld [vmem:[%s1602_s25 + $0x10] sm:$0xff] }
  0xad   : > { %v1057_v18 = vor.u32 %v1138_v16, %v1056_v15  ;;  %v469_v15 = vld [vmem:[%s1602_s25 + $0x18] sm:$0xff] }
  0xae   : > { %v595_v37 = vadd.f32 %v1249_v28, %v583_v27  ;;  %791 = vmatpush.bf16.msrb.mxu0 %v1069_v14  ;;  %1171 = vmatpush.bf16.msrb.mxu1 %v1069_v14 }
  0xaf   : > { %773 = vmatpush.bf16.msra.mxu3 %v1057_v18 }
  0xb0   : > { %v599_v46 = vmax.f32 %v595_v37, 0.0  ;;  %v683_v37 = vperm.slane %v508_v36, 1 }
  0xb2   : > { %v543_v34 = vpop.f32.mrf.mxu0  ;;  %792 = vmatpush.bf16.msrb.mxu0 %v1061_v20  ;;  %1172 = vmatpush.bf16.msrb.mxu1 %v1061_v20 }
  0xb3   : > { %v584_v35 = vpop.f32.mrf.mxu1 }
  0xb4   : > { %v585_v38 = vadd.f32 %v584_v35, %v543_v34 }
  0xb6   : > { %v596_v44 = vadd.f32 %v1249_v28, %v585_v38 }
  0xb8   : > { %v600_v47 = vmax.f32 %v596_v44, 0.0 }
  0xba   : > { %v603_v49 = vpack.c.bf16 %v600_v47, %v599_v46  ;;  %v546_v50 = vpop.f32.mrf.mxu0  ;;  %v466_v47 = vld [vmem:[%s1602_s25] sm:$0xff] }
  0xbb   : > { %v587_v51 = vpop.f32.mrf.mxu1 }
  0xbc   : > { %664 = vmatmul.bf16.vlgmr.msra.gmra.mxu2 %v603_v49  ;;  %v588_v52 = vadd.f32 %v587_v51, %v546_v50  ;;  %v682_v50 = vperm.slane %v508_v36, 0 }
  0xbe   : > { %v597_v55 = vadd.f32 %v1249_v28, %v588_v52 }
  0xc0   : > { %v601_v58 = vmax.f32 %v597_v55, 0.0 }
  0xc2   : > { %v548_v53 = vpop.f32.mrf.mxu0 }
  0xc3   : > { %v589_v54 = vpop.f32.mrf.mxu1 }
  0xc4   : > { %v590_v56 = vadd.f32 %v589_v54, %v548_v53  ;;  %v825_v54 = vand.u32 127, %v824_v48 }
  0xc6   : > { %v598_v57 = vadd.f32 %v1249_v28, %v590_v56  ;;  %vm827_vm1 = vcmp.lt.s32.totalorder %v825_v54, 96  ;;  %vm826_vm2 = vcmp.lt.s32.totalorder %v825_v54, 64 }
  0xc8   : > { %v602_v59 = vmax.f32 %v598_v57, 0.0  ;;  %v467_v57 = vld [vmem:[%s1602_s25 + $0x8] sm:$0xff] }
  0xca   : > { %v604_v60 = vpack.c.bf16 %v602_v59, %v601_v58 }
  0xcc   : > { %669 = vmatmul.bf16.gmra.mxu2 %v604_v60 }
 0x13f   : > { %v665_v21 = vpop.f32.mrf.mxu2 }
 0x140   : > { %v666_v23 = vadd.f32 %v1250_v22, %v665_v21 }
 0x142   : > { %v675_v26 = vmax.f32 %v666_v23, 0.0 }
 0x147   : > { %v667_v24 = vpop.f32.mrf.mxu2 }
 0x148   : > { %v668_v25 = vadd.f32 %v1250_v22, %v667_v24 }
 0x14a   : > { %v676_v27 = vmax.f32 %v668_v25, 0.0 }
 0x14c   : > { %v679_v28 = vpack.c.bf16 %v676_v27, %v675_v26 }
 0x14e   : > { %774 = vmatmul.bf16.vlgmr.msra.gmra.mxu3 %v679_v28  ;;  %793 = vmatmul.bf16.vlgmr.msrb.gmra.mxu0 %v679_v28 }
 0x14f   : > { %v670_v29 = vpop.f32.mrf.mxu2 }
 0x150   : > { %v671_v30 = vadd.f32 %v1250_v22, %v670_v29 }
 0x152   : > { %v677_v33 = vmax.f32 %v671_v30, 0.0 }
 0x157   : > { %v672_v31 = vpop.f32.mrf.mxu2 }
 0x158   : > { %v673_v32 = vadd.f32 %v1250_v22, %v672_v31 }
 0x15a   : > { %v678_v34 = vmax.f32 %v673_v32, 0.0 }
 0x15c   : > { %v680_v35 = vpack.c.bf16 %v678_v34, %v677_v33 }
 0x15e   : > { %779 = vmatmul.bf16.gmra.mxu3 %v680_v35  ;;  %798 = vmatmul.bf16.vlgmr.msrb.gmra.mxu1 %v680_v35 }
 0x1cb   : > { %v794_v38 = vpop.f32.mrf.mxu0 }
 0x1cc   : > { %v795_v39 = vadd.f32 %v794_v38, %v683_v37 }
 0x1ce   : > { %v804_v40 = vmul.f32 0.5, %v795_v39 }
 0x1d0   : > { %v808_v41 = vmul.f32 1.442695, %v804_v40 }
 0x1d1   : > { %v775_v42 = vpop.f32.mrf.mxu3 }
 0x1d2   : > { %1251 = vpow2.f32 %v808_v41  ;;  %v776_v56 = vadd.f32 %v775_v42, %v682_v50 }
 0x1d3   : > { %v796_v43 = vpop.f32.mrf.mxu0 }
 0x1d4   : > { %v797_v44 = vadd.f32 %v796_v43, %v683_v37 }
 0x1d6   : > { %v805_v45 = vmul.f32 0.5, %v797_v44 }
 0x1d8   : > { %v1252_v46 = vpop.eup %1251  ;;  %v810_v49 = vmul.f32 1.442695, %v805_v45 }
 0x1d9   : > { %v777_v51 = vpop.f32.mrf.mxu3  ;;  %v816_v52 = vmul.f32 %v1252_v46, %v466_v47 }
 0x1da   : > { %1253 = vpow2.f32 %v810_v49  ;;  %v778_v62 = vadd.f32 %v777_v51, %v682_v50 }
 0x1db   : > { %v799_v53 = vpop.f32.mrf.mxu1  ;;  %v820_v59 = vadd.f32 %v816_v52, %v776_v56 }
 0x1dc   : > { %v800_v55 = vadd.f32 %v799_v53, %v683_v37 }
 0x1dd   : > { %v828_v0 = vsel %vm827_vm1, %v820_v59, 0.0 }
 0x1de   : > { %v806_v58 = vmul.f32 0.5, %v800_v55  ;;  %v832_v6 = vsel %vm826_vm2, %v776_v56, %v828_v0 }
 0x1e0   : > { %v1254_v60 = vpop.eup %1253  ;;  %v812_v61 = vmul.f32 1.442695, %v806_v58 }
 0x1e1   : > { %v817_v63 = vmul.f32 %v1254_v60, %v467_v57  ;;  %v780_v3 = vpop.f32.mrf.mxu3 }
 0x1e2   : > { %1255 = vpow2.f32 %v812_v61  ;;  %v781_v14 = vadd.f32 %v780_v3, %v682_v50 }
 0x1e3   : > { %v821_v1 = vadd.f32 %v817_v63, %v778_v62  ;;  %v801_v2 = vpop.f32.mrf.mxu1 }
 0x1e4   : > { %v802_v4 = vadd.f32 %v801_v2, %v683_v37 }
 0x1e5   : > { %v829_v5 = vsel %vm827_vm1, %v821_v1, 0.0 }
 0x1e6   : > { %v833_v7 = vsel %vm826_vm2, %v778_v62, %v829_v5  ;;  %v807_v8 = vmul.f32 0.5, %v802_v4 }
 0x1e7   : > { %v1157_v9 = vpack.c.bf16 %v833_v7, %v832_v6 }
 0x1e8   : > { %v1256_v10 = vpop.eup %1255  ;;  %v814_v12 = vmul.f32 1.442695, %v807_v8 }
 0x1e9   : > { %1158 = vst [vmem:[%s437_s30] sm:$0xff] %v1157_v9   ;;  %v818_v13 = vmul.f32 %v1256_v10, %v468_v11  ;;  %v782_v16 = vpop.f32.mrf.mxu3 }
 0x1ea   : > { %1257 = vpow2.f32 %v814_v12  ;;  %v783_v19 = vadd.f32 %v782_v16, %v682_v50 }
 0x1eb   : > { %v822_v17 = vadd.f32 %v818_v13, %v781_v14 }
 0x1ed   : > { %v830_v21 = vsel %vm827_vm1, %v822_v17, 0.0 }
 0x1ee   : > { %v834_v24 = vsel %vm826_vm2, %v781_v14, %v830_v21 }
 0x1f0   : > { %v1258_v18 = vpop.eup %1257 }
 0x1f1   : > { %v819_v20 = vmul.f32 %v1258_v18, %v469_v15 }
 0x1f3   : > { %v823_v22 = vadd.f32 %v819_v20, %v783_v19 }
 0x1f5   : > { %v831_v23 = vsel %vm827_vm1, %v823_v22, 0.0 }
 0x1f6   : > { %v835_v25 = vsel %vm826_vm2, %v783_v19, %v831_v23 }
 0x1f7   : > { %v1162_v26 = vpack.c.bf16 %v835_v25, %v834_v24 }
 0x1f9   : > { %1164 = vst [vmem:[%s437_s30 + $0x8] sm:$0xff] %v1162_v26  }
 0x1fa   : > { %1376 = shalt.err (!%p1373_p8)
}
 0x1fb   : > { %s1428_s7 = smov 64   ;;  %s1429_s27 = smov 4  }
 0x1fc   : > { %1185 = dma.vmem_to_hbm [thread:$0]  (%p1528_p5), %s858_s28, 256, %s860_s29, %s845_s20, %s1428_s7, %s1428_s7, %s1429_s27  }
 0x1fd PF: > { %p1207_p9 = scmp.ge.s32.totalorder %s1419_s19, 2  ;;  %s874_s30 = sand.u32 1, %s1407_s16  }
 0x1fe   : > { %s875_s14 = scalar_lea.sflag [#allocation6], %s874_s30 }
 0x1ff   : > { %p1198_p10 = pnand %p1207_p9, %p1532_p6 }
 0x201   : > { %p1199_p11 = pneg %p1198_p10 }
 0x203   : > { %1402 = dma.done.wait (%p1199_p11), %s875_s14, 256  }
 0x204   : > { %1404 = vsyncadd (%p1199_p11), %s875_s14, 4294967040  ;;  %s1678_s19 = sld [smem:[#allocation15_spill]]  ;;  %s1681_s16 = smov %s1411_s17 }
 0x205   : > { %s1679_s15 = sld [smem:[#allocation14_spill]] }
 0x206   : > { %s1680_s18 = sld [smem:[#allocation16_spill]] }
 0x20a   : > { %p24_p12 = scmp.ge.s32.totalorder %s1678_s19, 4  }
 0x20b   : > { %s1682_s17 = smov %s1679_s15 }
 0x20c   :  { %26 = sbr.rel (!%p24_p12) target bundleno = 8 (0x8), region = 114 }
 0x211   :  { %881 = vsyncpa [#allocation5], 1 }
 0x212   :  { %883 = vsyncpa [#allocation5 + $0x1], 1 }
 0x213   :  { %884 = vsyncpa [#allocation8], 1 }
 0x214   :  { %885 = vsyncpa [#allocation6], 1 }
 0x215   :  { %887 = vsyncpa [#allocation6 + $0x1], 1 }

</bundles_post_ra>
